<compile_context>
chip_gen: v7x
topology: tpu7x:2x2x1
jax: 0.10.0
libtpu: 0.0.40
codegen_flags: <defaults>
</compile_context>

<pallas_src>
import jax
import jax.numpy as jnp
from jax import lax
from jax.experimental import pallas as pl
from jax.experimental.pallas import tpu as pltpu


def _cdiv(a, b):
    return -(-a // b)


def _make_conv_bn_relu_kernel(KH, KW, SH, SW, TH, Wout, Cin, HALO, fold_kh):
    """Kernel for one (n, cout_tile, row_block) step: im2col-in-VMEM matmul + BN bias + ReLU."""
    M = TH * Wout
    w_span = (Wout - 1) * SW + 1

    def _taps_for_row(window, kh):
        # rows r*SH + kh for r in [0, TH): (TH, Wp, Cin)
        rows = lax.slice_in_dim(window, kh, kh + (TH - 1) * SH + 1, SH, axis=0)
        # sliding window along W for each kw tap: (TH, Wout, Cin) each
        return [lax.slice_in_dim(rows, kw, kw + w_span, SW, axis=1) for kw in range(KW)]

    def kernel(*refs):
        if HALO > 0:
            xa_ref, xb_ref, w_ref, b_ref, o_ref = refs
            # current TH*SH rows + HALO rows from the halo view -> full input window
            window = jnp.concatenate(
                [xa_ref[...], xb_ref[pl.ds(0, HALO), :, :]], axis=0)
        else:
            xa_ref, w_ref, b_ref, o_ref = refs
            window = xa_ref[...]

        if fold_kh:
            # One MXU matmul per step: contraction over (kh, kw, cin).
            taps = []
            for kh in range(KH):
                taps += _taps_for_row(window, kh)
            lhs = jnp.concatenate(taps, axis=-1) if len(taps) > 1 else taps[0]
            acc = jnp.dot(lhs.reshape(M, KH * KW * Cin), w_ref[...],
                          preferred_element_type=jnp.float32)
        else:
            # KH matmuls per step: contraction over (kw, cin).
            acc = None
            for kh in range(KH):
                taps = _taps_for_row(window, kh)
                lhs = jnp.concatenate(taps, axis=-1) if KW > 1 else taps[0]
                d = jnp.dot(lhs.reshape(M, KW * Cin), w_ref[kh],
                            preferred_element_type=jnp.float32)
                acc = d if acc is None else acc + d

        y = acc + b_ref[...]                                   # folded BatchNorm (eval mode)
        o_ref[...] = jnp.maximum(y, 0.0).astype(o_ref.dtype)   # ReLU, bf16 lane-dense store

    return kernel


def basic_conv2d(x, weight, gamma, beta, running_mean, running_var,
                 *, stride=1, padding=0, eps=1e-3, out_dtype=jnp.bfloat16):
    """x: (N, Cin, H, W) f32; weight: (Cout, Cin, KH, KW).

    Returns (N, Cout, Hout, Wout) in `out_dtype` (bf16 by default: halves writeback traffic;
    accumulation / BN / ReLU are done in f32 inside the kernel).
    """
    N, C, H, W = x.shape
    Cout, Cin, KH, KW = weight.shape
    assert C == Cin
    SH, SW = (stride, stride) if isinstance(stride, int) else tuple(stride)
    PH, PW = (padding, padding) if isinstance(padding, int) else tuple(padding)

    Hp, Wp = H + 2 * PH, W + 2 * PW
    Hout = (Hp - KH) // SH + 1
    Wout = (Wp - KW) // SW + 1

    LANE = 128
    Cout_p = _cdiv(Cout, LANE) * LANE
    TCO = LANE                       # 128-lane Cout tile: safe vreg/VMEM budget on v5e/v6e/v7x
    COB = Cout_p // TCO

    # ---- output-row tile TH: M = TH*Wout targeted at ~256 MXU rows, 8-aligned stores ------
    HALO = KH - SH                                    # extra input rows beyond each block
    TH = max(1, min(Hout, _cdiv(256, Wout)))
    if HALO > 0:
        TH = max(TH, _cdiv(HALO, SH))                 # two-view halo needs TH*SH >= HALO
    if (TH * Wout) % 8 != 0:
        TH = _cdiv(TH, 8) * 8                         # keep the store sublane dim 8-aligned
    THs = TH * SH
    HB = _cdiv(Hout, TH)
    HoP = HB * TH                                     # padded Hout (extra rows sliced off)
    if HALO > 0:
        # smallest divisor of THs that covers the halo -> near-1x input read amplification
        hb_rows = next(d for d in range(1, THs + 1) if THs % d == 0 and d >= HALO)
    else:
        hb_rows = 0

    # ---- glue: NCHW -> NHWC (Cin on the lane axis), zero-pad, bf16 operands ---------------
    rows_needed = HB * THs + hb_rows                  # rows touched by the blocked fetches
    x_nhwc = jnp.transpose(x, (0, 2, 3, 1))                                   # (N, H, W, Cin)
    x_pad = jnp.pad(
        x_nhwc,
        ((0, 0), (PH, PH + max(0, rows_needed - Hp)), (PW, PW), (0, 0)),
    ).astype(jnp.bfloat16)

    # ---- fold BatchNorm (eval mode): scale into the conv weights, bias kept separate ------
    scale = gamma / jnp.sqrt(running_var + eps)                               # (Cout,)
    bias = beta - running_mean * scale                                        # (Cout,)
    w = jnp.transpose(weight, (2, 3, 1, 0)) * scale[None, None, None, :]      # (KH,KW,Cin,Cout)
    w = jnp.pad(w, ((0, 0), (0, 0), (0, 0), (0, Cout_p - Cout))).astype(jnp.bfloat16)
    b = jnp.pad(bias, (0, Cout_p - Cout)).reshape(1, Cout_p).astype(jnp.float32)

    # Fold KH into the contraction too when the whole im2col depth is small.
    fold_kh = (KH * KW * Cin) <= 1024
    if fold_kh:
        w = w.reshape(KH * KW * Cin, Cout_p)
        w_spec = pl.BlockSpec((KH * KW * Cin, TCO), lambda n, co, hb: (0, co))
    else:
        w = w.reshape(KH, KW * Cin, Cout_p)
        w_spec = pl.BlockSpec((KH, KW * Cin, TCO), lambda n, co, hb: (0, 0, co))

    kernel = _make_conv_bn_relu_kernel(KH, KW, SH, SW, TH, Wout, Cin, HALO, fold_kh)

    # Current block (TH*SH rows) + small halo view (next hb_rows rows) of the same array:
    # both are plain Blocked specs -> auto double-buffered pipelining, ~1x input HBM reads.
    xa_spec = pl.BlockSpec((None, THs, Wp, Cin), lambda n, co, hb: (n, hb, 0, 0))
    in_specs = [xa_spec]
    operands = [x_pad]
    if HALO > 0:
        blk_ratio = THs // hb_rows
        xb_spec = pl.BlockSpec((None, hb_rows, Wp, Cin),
                               lambda n, co, hb: (n, (hb + 1) * blk_ratio, 0, 0))
        in_specs.append(xb_spec)
        operands.append(x_pad)
    in_specs += [w_spec, pl.BlockSpec((1, TCO), lambda n, co, hb: (0, co))]
    operands += [w, b]

    # Output kept flattened: each step writes one contiguous lane-dense (TH*Wout, TCO) block.
    o_spec = pl.BlockSpec((None, TH * Wout, TCO), lambda n, co, hb: (n, hb, co))

    flops = 2 * N * HoP * Wout * KH * KW * Cin * Cout_p
    bytes_accessed = (N * COB * HB * (THs + hb_rows) * Wp * Cin * 2   # input (+halo) reads
                      + N * int(w.size) * 2                           # weights, refetched per (n, co)
                      + N * Cout_p * 4                                # bias
                      + N * HoP * Wout * Cout_p * 2)                  # bf16 output writeback

    out_flat = pl.pallas_call(
        kernel,
        out_shape=jax.ShapeDtypeStruct((N, HoP * Wout, Cout_p), out_dtype),
        grid_spec=pltpu.PrefetchScalarGridSpec(
            num_scalar_prefetch=0,
            grid=(N, COB, HB),                       # weights resident across the hb axis
            in_specs=in_specs,
            out_specs=o_spec,
        ),
        compiler_params=pltpu.CompilerParams(
            dimension_semantics=("parallel", "parallel", "parallel")),
        cost_estimate=pl.CostEstimate(flops=flops, transcendentals=0,
                                      bytes_accessed=bytes_accessed),
    )(*operands)

    # ---- glue: drop padding, back to NCHW for the PyTorch-facing API -----------------------
    out = out_flat.reshape(N, HoP, Wout, Cout_p)[:, :Hout, :, :Cout]
    return jnp.transpose(out, (0, 3, 1, 2))                                   # (N, Cout, Hout, Wout)


# -------------------------- references for verification -------------------------------------
def _reference_f32(x, weight, gamma, beta, running_mean, running_var,
                   *, stride=1, padding=1, eps=1e-3):
    y = jax.lax.conv_general_dilated(
        x, weight, window_strides=(stride, stride),
        padding=[(padding, padding), (padding, padding)],
        dimension_numbers=("NCHW", "OIHW", "NCHW"))
    scale = gamma / jnp.sqrt(running_var + eps)
    bias = beta - running_mean * scale
    return jnp.maximum(y * scale[None, :, None, None] + bias[None, :, None, None], 0.0)


def _reference_bf16(x, weight, gamma, beta, running_mean, running_var,
                    *, stride=1, padding=1, eps=1e-3):
    # Same bf16 operand quantization as the kernel (BN scale folded into weights first),
    # f32 accumulation -> should match the Pallas kernel to ~1 bf16 ulp after output rounding.
    scale = gamma / jnp.sqrt(running_var + eps)
    bias = beta - running_mean * scale
    wq = (weight * scale[:, None, None, None]).astype(jnp.bfloat16)
    xq = x.astype(jnp.bfloat16)
    y = jax.lax.conv_general_dilated(
        xq, wq, window_strides=(stride, stride),
        padding=[(padding, padding), (padding, padding)],
        dimension_numbers=("NCHW", "OIHW", "NCHW"),
        preferred_element_type=jnp.float32)
    return jnp.maximum(y + bias[None, :, None, None], 0.0)


if __name__ == "__main__":
    key = jax.random.PRNGKey(0)
    k1, k2, k3, k4, k5, k6 = jax.random.split(key, 6)

    N, Cin, H, W = 2, 4, 16, 16
    Cout, KH, KW = 8, 3, 3

    x = jax.random.normal(k1, (N, Cin, H, W), dtype=jnp.float32)
    weight = jax.random.normal(k2, (Cout, Cin, KH, KW), dtype=jnp.float32) * 0.1
    gamma = jax.random.uniform(k3, (Cout,), minval=0.5, maxval=1.5, dtype=jnp.float32)
    beta = jax.random.normal(k4, (Cout,), dtype=jnp.float32) * 0.1
    running_mean = jax.random.normal(k5, (Cout,), dtype=jnp.float32) * 0.1
    running_var = jax.random.uniform(k6, (Cout,), minval=0.5, maxval=1.5, dtype=jnp.float32)

    out = basic_conv2d(x, weight, gamma, beta, running_mean, running_var,
                       stride=1, padding=1, eps=1e-3)
    out = jax.block_until_ready(out)
    assert out.shape == (N, Cout, H, W), out.shape
    assert out.dtype == jnp.bfloat16, out.dtype
    out_f32 = out.astype(jnp.float32)

    # Tight check vs a reference using the same bf16 operand + output quantization.
    ref_q = _reference_bf16(x, weight, gamma, beta, running_mean, running_var,
                            stride=1, padding=1, eps=1e-3)
    ref_q = ref_q.astype(jnp.bfloat16).astype(jnp.float32)
    err_q = float(jnp.max(jnp.abs(out_f32 - ref_q)))
    assert jnp.allclose(out_f32, ref_q, atol=5e-2, rtol=5e-2), err_q

    # Loose sanity check vs the full-f32 PyTorch-semantics reference (bf16 rounding expected).
    ref_f = _reference_f32(x, weight, gamma, beta, running_mean, running_var,
                           stride=1, padding=1, eps=1e-3)
    err_f = float(jnp.max(jnp.abs(out_f32 - ref_f)))
    assert jnp.allclose(out_f32, ref_f, atol=2e-1, rtol=1e-1), err_f

    print("KERNEL_OK")
</pallas_src>

<mosaic_0001>
module attributes {stable_mosaic.version = 11 : i64} {
  func.func @kernel(%arg0: i32, %arg1: i32, %arg2: i32, %arg3: memref<1x16x18x4xbf16, #tpu.memory_space<vmem>>, %arg4: memref<1x2x18x4xbf16, #tpu.memory_space<vmem>>, %arg5: memref<36x128xbf16, #tpu.memory_space<vmem>>, %arg6: memref<1x128xf32, #tpu.memory_space<vmem>>, %arg7: memref<1x256x128xbf16, #tpu.memory_space<vmem>>) attributes {dimension_semantics = [#tpu.dimension_semantics<parallel>, #tpu.dimension_semantics<parallel>, #tpu.dimension_semantics<parallel>], iteration_bounds = array<i64: 2, 1, 1>, scalar_prefetch = 0 : i64, scratch_operands = 0 : i64, tpu.core_type = #tpu.core_type<tc>, window_params = [{transform_indices = @transform_0, window_bounds = array<i64: 1, 16, 18, 4>}, {transform_indices = @transform_1, window_bounds = array<i64: 1, 2, 18, 4>}, {transform_indices = @transform_2, window_bounds = array<i64: 36, 128>}, {transform_indices = @transform_3, window_bounds = array<i64: 1, 128>}, {transform_indices = @transform_4, window_bounds = array<i64: 1, 256, 128>}]} {
    %c0 = arith.constant 0 : index
    %c0_0 = arith.constant 0 : index
    %c0_1 = arith.constant 0 : index
    %c0_2 = arith.constant 0 : index
    %0 = vector.load %arg3[%c0, %c0_0, %c0_1, %c0_2] : memref<1x16x18x4xbf16, #tpu.memory_space<vmem>>, vector<1x16x18x4xbf16>
    %1 = vector.shape_cast %0 : vector<1x16x18x4xbf16> to vector<16x18x4xbf16>
    %c0_3 = arith.constant 0 : index
    %c0_4 = arith.constant 0 : index
    %c0_5 = arith.constant 0 : index
    %c0_6 = arith.constant 0 : index
    %2 = vector.load %arg4[%c0_3, %c0_4, %c0_5, %c0_6] : memref<1x2x18x4xbf16, #tpu.memory_space<vmem>>, vector<1x2x18x4xbf16>
    %3 = vector.shape_cast %2 : vector<1x2x18x4xbf16> to vector<2x18x4xbf16>
    %4 = tpu.concatenate %1, %3 in 0 : vector<16x18x4xbf16>, vector<2x18x4xbf16> -> vector<18x18x4xbf16>
    %5 = vector.extract_strided_slice %4 {offsets = [0, 0, 0], sizes = [16, 18, 4], strides = [1, 1, 1]} : vector<18x18x4xbf16> to vector<16x18x4xbf16>
    %6 = vector.extract_strided_slice %5 {offsets = [0, 0, 0], sizes = [16, 16, 4], strides = [1, 1, 1]} : vector<16x18x4xbf16> to vector<16x16x4xbf16>
    %7 = vector.extract_strided_slice %5 {offsets = [0, 1, 0], sizes = [16, 16, 4], strides = [1, 1, 1]} : vector<16x18x4xbf16> to vector<16x16x4xbf16>
    %8 = vector.extract_strided_slice %5 {offsets = [0, 2, 0], sizes = [16, 16, 4], strides = [1, 1, 1]} : vector<16x18x4xbf16> to vector<16x16x4xbf16>
    %9 = vector.extract_strided_slice %4 {offsets = [1, 0, 0], sizes = [16, 18, 4], strides = [1, 1, 1]} : vector<18x18x4xbf16> to vector<16x18x4xbf16>
    %10 = vector.extract_strided_slice %9 {offsets = [0, 0, 0], sizes = [16, 16, 4], strides = [1, 1, 1]} : vector<16x18x4xbf16> to vector<16x16x4xbf16>
    %11 = vector.extract_strided_slice %9 {offsets = [0, 1, 0], sizes = [16, 16, 4], strides = [1, 1, 1]} : vector<16x18x4xbf16> to vector<16x16x4xbf16>
    %12 = vector.extract_strided_slice %9 {offsets = [0, 2, 0], sizes = [16, 16, 4], strides = [1, 1, 1]} : vector<16x18x4xbf16> to vector<16x16x4xbf16>
    %13 = vector.extract_strided_slice %4 {offsets = [2, 0, 0], sizes = [16, 18, 4], strides = [1, 1, 1]} : vector<18x18x4xbf16> to vector<16x18x4xbf16>
    %14 = vector.extract_strided_slice %13 {offsets = [0, 0, 0], sizes = [16, 16, 4], strides = [1, 1, 1]} : vector<16x18x4xbf16> to vector<16x16x4xbf16>
    %15 = vector.extract_strided_slice %13 {offsets = [0, 1, 0], sizes = [16, 16, 4], strides = [1, 1, 1]} : vector<16x18x4xbf16> to vector<16x16x4xbf16>
    %16 = vector.extract_strided_slice %13 {offsets = [0, 2, 0], sizes = [16, 16, 4], strides = [1, 1, 1]} : vector<16x18x4xbf16> to vector<16x16x4xbf16>
    %17 = tpu.concatenate %6, %7, %8, %10, %11, %12, %14, %15, %16 in 2 : vector<16x16x4xbf16>, vector<16x16x4xbf16>, vector<16x16x4xbf16>, vector<16x16x4xbf16>, vector<16x16x4xbf16>, vector<16x16x4xbf16>, vector<16x16x4xbf16>, vector<16x16x4xbf16>, vector<16x16x4xbf16> -> vector<16x16x36xbf16>
    %18 = vector.shape_cast %17 : vector<16x16x36xbf16> to vector<256x36xbf16>
    %c0_7 = arith.constant 0 : index
    %c0_8 = arith.constant 0 : index
    %19 = vector.load %arg5[%c0_7, %c0_8] : memref<36x128xbf16, #tpu.memory_space<vmem>>, vector<36x128xbf16>
    %cst = arith.constant dense<0.000000e+00> : vector<256x128xf32>
    %20 = tpu.matmul %18, %19, %cst {dimension_numbers = #tpu.dot_dimension_numbers<[1], [0], [0], [1], [0, 0, 1, 1], [], []>} : vector<256x36xbf16>, vector<36x128xbf16>, vector<256x128xf32> -> vector<256x128xf32>
    %c0_9 = arith.constant 0 : index
    %c0_10 = arith.constant 0 : index
    %21 = vector.load %arg6[%c0_9, %c0_10] : memref<1x128xf32, #tpu.memory_space<vmem>>, vector<1x128xf32>
    %22 = vector.broadcast %21 : vector<1x128xf32> to vector<256x128xf32>
    %23 = arith.addf %20, %22 : vector<256x128xf32>
    %cst_11 = arith.constant 0.000000e+00 : f32
    %24 = vector.broadcast %cst_11 : f32 to vector<256x128xf32>
    %25 = arith.maximumf %23, %24 : vector<256x128xf32>
    %26 = arith.truncf %25 : vector<256x128xf32> to vector<256x128xbf16>
    %c0_12 = arith.constant 0 : index
    %c0_13 = arith.constant 0 : index
    %c0_14 = arith.constant 0 : index
    %27 = vector.load %arg7[%c0_12, %c0_13, %c0_14] : memref<1x256x128xbf16, #tpu.memory_space<vmem>>, vector<1x256x128xbf16>
    %28 = vector.shape_cast %27 : vector<1x256x128xbf16> to vector<256x128xbf16>
    %29 = vector.shape_cast %26 : vector<256x128xbf16> to vector<1x256x128xbf16>
    tpu.vector_store %arg7[%c0_12, %c0_13, %c0_14], %29 {strides = array<i32>} : memref<1x256x128xbf16, #tpu.memory_space<vmem>>, vector<1x256x128xbf16>,
    return
  }
  func.func @transform_0(%arg0: i32, %arg1: i32, %arg2: i32) -> (i32, i32, i32, i32) {
    %c0_i32 = arith.constant 0 : i32
    %c0_i32_0 = arith.constant 0 : i32
    %c0_i32_1 = arith.constant 0 : i32
    return %arg0, %arg2, %c0_i32, %c0_i32_0 : i32, i32, i32, i32
  }
  func.func @transform_1(%arg0: i32, %arg1: i32, %arg2: i32) -> (i32, i32, i32, i32) {
    %c1_i32 = arith.constant 1 : i32
    %0 = arith.addi %arg2, %c1_i32 : i32
    %c8_i32 = arith.constant 8 : i32
    %1 = arith.muli %0, %c8_i32 : i32
    %c0_i32 = arith.constant 0 : i32
    %c0_i32_0 = arith.constant 0 : i32
    %c0_i32_1 = arith.constant 0 : i32
    return %arg0, %1, %c0_i32, %c0_i32_0 : i32, i32, i32, i32
  }
  func.func @transform_2(%arg0: i32, %arg1: i32, %arg2: i32) -> (i32, i32) {
    %c0_i32 = arith.constant 0 : i32
    %c0_i32_0 = arith.constant 0 : i32
    return %c0_i32, %arg1 : i32, i32
  }
  func.func @transform_3(%arg0: i32, %arg1: i32, %arg2: i32) -> (i32, i32) {
    %c0_i32 = arith.constant 0 : i32
    %c0_i32_0 = arith.constant 0 : i32
    return %c0_i32, %arg1 : i32, i32
  }
  func.func @transform_4(%arg0: i32, %arg1: i32, %arg2: i32) -> (i32, i32, i32) {
    %c0_i32 = arith.constant 0 : i32
    return %arg0, %arg2, %arg1 : i32, i32, i32
  }
}

</mosaic_0001>

<bundles_post_ra>
// kernel: tpu_custom_call.1
= control target key start
LH: loop header
LB: loop body
LE: loop exit
PB: predicated region body
PF: predicated region fallthrough
CT: control target
= control target key end

     0   :  { %9 = vsyncpa [#allocation3], 0  ;;  %s3286_s0 = inlined_call_operand.vmem [shape: bf16[2,18,18,4], index: 0, kind: input, shape index: {}]   ;;  %s3287_s1 = inlined_call_operand.vmem [shape: bf16[2,18,18,4], index: 1, kind: input, shape index: {}]   ;;  %s3288_s2 = inlined_call_operand.vmem [shape: bf16[36,128], index: 2, kind: input, shape index: {}]   ;;  %s3289_s3 = inlined_call_operand.vmem [shape: f32[1,128], index: 3, kind: input, shape index: {}]   ;;  %s3290_s4 = inlined_call_operand.hbm [shape: bf16[2,256,128], index: 4, kind: output, shape index: {}]  }
   0x1   :  { %11 = vsyncpa [#allocation3 + $0x1], 0  ;;  %s2428_s15 = smov 0   ;;  %s2430_s16 = smov 0  }
   0x2   :  { %s2432_s17 = smov 0   ;;  %s2434_s18 = smov 0  }
   0x3   :  { %s2436_s19 = smov 0   ;;  %s2438_s20 = smov 0  }
   0x4 LB: > { %s1907_s21 = sadd.s32 4294967295, %s2391_s20   ;;  %s1908_s22 = sadd.s32 4294967294, %s2391_s20   ;;  %s2391_s20 = sphi %s2438_s20, %s17_s20   ;;  %s2387_s19 = sphi %s2436_s19, %s3297_s19   ;;  %s2383_s18 = sphi %s2434_s18, %s3296_s18   ;;  %s2379_s17 = sphi %s2432_s17, %s3295_s17   ;;  %s2375_s16 = sphi %s2430_s16, %s3294_s16   ;;  %s2371_s15 = sphi %s2428_s15, %s3293_s15  }
   0x5   : > { %s36_s23 = sadd.s32 1, %s2387_s19  ;;  %s159_s24 = sadd.s32 1, %s2379_s17 }
   0x6   : > { %p38_p0 = scmp.ge.s32.totalorder %s36_s23, 2  ;;  %p169_p1 = scmp.ne.s32.totalorder %s2379_s17, %s2375_s16 }
   0x7   : > { %p170_p2 = scmp.eq.s32.totalorder %s1907_s21, 1  ;;  %p175_p3 = scmp.ne.s32.totalorder %s2375_s16, %s2371_s15 }
   0x8   : > { %s3299_s23 = smov (%p38_p0, %s36_s23), 0  ;;  %p176_p5 = scmp.eq.s32.totalorder %s1908_s22, 1 }
   0x9   : > { %p2468_p4 = por %p170_p2, %p169_p1  ;;  %s152_s26 = ssub.s32 %s2387_s19, %s3299_s23 }
   0xa   : > { %p1913_p6 = scmp.ge.s32.totalorder %s2391_s20, 1  ;;  %p157_p7 = scmp.eq.s32.totalorder %s152_s26, 0 }
   0xb   : > { %p2475_p8 = por %p176_p5, %p175_p3  ;;  %p249_p9 = scmp.lt.s32.totalorder %s2391_s20, 3 }
   0xc   : > { %s2481_s28 = scalar_select %p157_p7, %s2379_s17, %s159_s24  }
   0xd   : > { %p250_p10 = pnand %p1913_p6, %p249_p9 }
   0xe   : > { %p310_p11 = scmp.lt.s32.totalorder (!%p250_p10), %s2383_s18, 1  ;;  %vm756_vm0 = vcmask (!%p250_p10), 1046528   ;;  %s2393_s8 = smov (!%p250_p10), 12   ;;  %vm531_vm1 = vsmask.f32 (!%p250_p10), 7424  ;;  %vm1399_vm2 = vcmask (!%p250_p10), 1041408  }
   0xf   : > { %253 = sbr.rel (%p250_p10) target bundleno = 633 (0x279), region = 36  ;;  %s2394_s9 = smov (!%p250_p10), 8   ;;  %vm1075_vm3 = vcmask (!%p250_p10), 31744   ;;  %vm1108_vm4 = vcmask (!%p250_p10), 64512   ;;  %vm1174_vm5 = vcmask (!%p250_p10), 130048   ;;  %vm1141_vm6 = vcmask (!%p250_p10), 97280  }
  0x10   : > { %s2395_s10 = smov (!%p250_p10), 4   ;;  %s2396_s11 = smov (!%p250_p10), 16   ;;  %vm1207_vm7 = vcmask (!%p250_p10), 162816   ;;  %vm1240_vm8 = vcmask (!%p250_p10), 195584   ;;  %vm1273_vm9 = vcmask (!%p250_p10), 228352   ;;  %vm1306_vm10 = vcmask (!%p250_p10), 261120  }
  0x11   : > { %s2397_s12 = smov (!%p250_p10), 20   ;;  %s2398_s13 = smov (!%p250_p10), 24   ;;  %vm1366_vm11 = vcmask (!%p250_p10), 293888  }
  0x12   : > { %s2399_s26 = smov (!%p250_p10), 28   ;;  %s2400_s14 = smov (!%p250_p10), 32  }
  0x16   : > { %s2485_s29 = scalar_select %p310_p11, %s2383_s18, 1 }
  0x18   : > { %s2205_s30 = smul.u32 216, %s2485_s29 }
  0x1a   : > { %s2493_s7 = scalar_lea.vmem %s3286_s0, %s2205_s30  ;;  %s2011_s21 = sadd.s32 192, %s2205_s30 }
  0x1b   : > { %v2496_v0 = vld [vmem:[%s2493_s7 + $0x6c] sm:$0xff]   ;;  %v2506_v2 = vld [vmem:[%s2493_s7 + $0x60] sm:$0xff]   ;;  %v2275_v3 = vld [vmem:[%s2493_s7 + $0x68] ss:$0 sps:$4 sm:$0x11]   ;;  %s2679_s5 = scalar_lea.vmem %s3287_s1, %s2011_s21  ;;  %s2401_s21 = smov [#allocation2]  }
  0x1c   : > { %v2499_v1 = vld [vmem:[%s2493_s7 + $0xc] sm:$0xff]   ;;  %858 = vrot.lane.b32.xlu1 %v2496_v0, %s2393_s8  ;;  %v2510_v4 = vld [vmem:[%s2493_s7] sm:$0xff]   ;;  %v784_v5 = vrot.slane %v2496_v0, 1  ;;  %v781_v6 = vrot.slane %v2506_v2, 1  ;;  %v782_v7 = vrot.slane %v2275_v3, 1  ;;  %v641_v26 = vshrl.u32 %v2496_v0, 16 }
  0x1d   : > { %842 = vrot.lane.b32.xlu0 %v2499_v1, %s2393_s8  ;;  %v2277_v8 = vld [vmem:[%s2493_s7 + $0x8] ss:$0 sps:$4 sm:$0x11]   ;;  %v760_v9 = vrot.slane %v2499_v1, 1  ;;  %v757_v10 = vrot.slane %v2510_v4, 1  ;;  %v545_v16 = vshrl.u32 %v2499_v1, 16 }
  0x1e   : > { %v2278_v11 = vld [vmem:[%s2493_s7 + $0x74] ss:$0 sps:$4 sm:$0x11]   ;;  %v2519_v12 = vsel %vm756_vm0, %v781_v6, %v782_v7  ;;  %v758_v13 = vrot.slane %v2277_v8, 1  ;;  %v547_v17 = vshll.u32 %v2499_v1, 16  ;;  %v533_v18 = vshrl.u32 %v2510_v4, 16 }
  0x1f   : > { %v2279_v14 = vld [vmem:[%s2493_s7 + $0x14] ss:$0 sps:$4 sm:$0x11]   ;;  %v785_v15 = vrot.slane %v2278_v11, 1  ;;  %v535_v22 = vshll.u32 %v2510_v4, 16  ;;  %v540_v25 = vshll.u32 %v2277_v8, 16 }
  0x20   : > { %821 = vrot.lane.b32.xlu1 %v2519_v12, %s2394_s9  ;;  %v759_v19 = vsel %vm756_vm0, %v757_v10, %v758_v13  ;;  %v761_v20 = vrot.slane %v2279_v14, 1  ;;  %v552_v21 = vshll.u32 %v2279_v14, 16  ;;  %v549_v24 = vrot.slane %v547_v17, 1  ;;  %v2541_v39 = vld [vmem:[%s2493_s7 + $0x78] sm:$0xff]   ;;  %v2599_v14 = vld [vmem:[%s2493_s7 + $0x24] sm:$0xff]   ;;  %s2317_s22 = sshll.u32 %s2401_s21, 4  ;;  %s2318_s22 = int_to_ptr.vmem [resolvable:$false] %s2317_s22 }
  0x21   : > { %805 = vrot.lane.b32.xlu0 %v759_v19, %s2394_s9  ;;  %v2531_v23 = vsel %vm756_vm0, %v784_v5, %v785_v15  ;;  %v537_v29 = vrot.slane %v535_v22, 1  ;;  %v643_v30 = vshll.u32 %v2496_v0, 16  ;;  %v542_v32 = vrot.slane %v540_v25, 1  ;;  %v2547_v46 = vld [vmem:[%s2493_s7 + $0x18] sm:$0xff]   ;;  %v2300_v19 = vld [vmem:[%s3288_s2] sm:$0xff]   ;;  %s2319_s24 = scalar_lea.vmem %s2318_s22, 4096 }
  0x22   : > { %v762_v27 = vsel %vm756_vm0, %v760_v9, %v761_v20  ;;  %v554_v28 = vrot.slane %v552_v21, 1  ;;  %v550_v31 = vor.u32 %v549_v24, %v545_v16  ;;  %v648_v33 = vshll.u32 %v2278_v11, 16  ;;  %v2282_v47 = vld [vmem:[%s2493_s7 + $0x80] ss:$0 sps:$4 sm:$0x11]   ;;  %v2592_v11 = vld [vmem:[%s2493_s7 + $0x84] sm:$0xff]   ;;  %2159 = vmatprep.subr.bf16.mxu0 %v2300_v19  ;;  %2197 = vmatprep.subr.bf16.mxu1 %v2300_v19 }
  0x23   : > { %v629_v34 = vshrl.u32 %v2506_v2, 16  ;;  %v538_v35 = vor.u32 %v537_v29, %v533_v18  ;;  %v645_v36 = vrot.slane %v643_v30, 1  ;;  %v631_v37 = vshll.u32 %v2506_v2, 16  ;;  %v2283_v52 = vld [vmem:[%s2493_s7 + $0x20] ss:$0 sps:$4 sm:$0x11]   ;;  %2160 = vmatpush3.bf16.msra.mxu0 %v2300_v19  ;;  %2200 = vmatpush3.bf16.msra.mxu1 %v2300_v19 }
  0x24   : > { %823 = vrot.lane.b32.xlu1 %v2531_v23, %s2394_s9  ;;  %v636_v38 = vshll.u32 %v2275_v3, 16  ;;  %v555_v40 = vsel %vm531_vm1, %v550_v31, %v554_v28  ;;  %v650_v41 = vrot.slane %v648_v33, 1  ;;  %v655_v50 = vshll.u32 %v2541_v39, 16  ;;  %v2286_v15 = vld [vmem:[%s2493_s7 + $0x8c] ss:$0 sps:$4 sm:$0x11]  }
  0x25   : > { %807 = vrot.lane.b32.xlu0 %v762_v27, %s2394_s9  ;;  %v543_v42 = vsel %vm531_vm1, %v538_v35, %v542_v32  ;;  %v646_v43 = vor.u32 %v645_v36, %v641_v26  ;;  %v633_v44 = vrot.slane %v631_v37, 1  ;;  %v559_v53 = vshll.u32 %v2547_v46, 16  ;;  %v2287_v17 = vld [vmem:[%s2493_s7 + $0x2c] ss:$0 sps:$4 sm:$0x11]  }
  0x26   : > { %v638_v45 = vrot.slane %v636_v38, 1  ;;  %v653_v54 = vshrl.u32 %v2541_v39, 16  ;;  %v657_v55 = vrot.slane %v655_v50, 1  ;;  %v660_v56 = vshll.u32 %v2282_v47, 16 }
  0x27   : > { %v2552_v48 = vsel %vm531_vm1, %v646_v43, %v650_v41  ;;  %v634_v49 = vor.u32 %v633_v44, %v629_v34  ;;  %v557_v57 = vshrl.u32 %v2547_v46, 16  ;;  %v561_v58 = vrot.slane %v559_v53, 1  ;;  %v2304_v32 = vld [vmem:[%s3288_s2 + $0x10] ss:$0 sps:$4 sm:$0x33]  }
  0x28   : > { %726 = vrot.lane.b32.xlu1 %v555_v40, %s2395_s10  ;;  %v564_v59 = vshll.u32 %v2283_v52, 16  ;;  %v658_v60 = vor.u32 %v657_v55, %v653_v54  ;;  %v662_v61 = vrot.slane %v660_v56, 1  ;;  %v787_v6 = vrot.slane %v2541_v39, 1  ;;  %v2655_v43 = vld [vmem:[%s2493_s7 + $0x90] sm:$0xff]  }
  0x29   : > { %724 = vrot.lane.b32.xlu0 %v543_v42, %s2395_s10  ;;  %v2557_v51 = vsel %vm531_vm1, %v634_v49, %v638_v45  ;;  %v562_v62 = vor.u32 %v561_v58, %v557_v57  ;;  %v788_v7 = vrot.slane %v2282_v47, 1  ;;  %v763_v8 = vrot.slane %v2547_v46, 1  ;;  %v2660_v44 = vld [vmem:[%s2493_s7 + $0x30] sm:$0xff]   ;;  %v2290_v45 = vld [vmem:[%s2493_s7 + $0x98] ss:$0 sps:$4 sm:$0x11]  }
  0x2a   : > { %v566_v63 = vrot.slane %v564_v59, 1  ;;  %v2574_v3 = vsel %vm531_vm1, %v658_v60, %v662_v61  ;;  %v764_v9 = vrot.slane %v2283_v52, 1  ;;  %v667_v16 = vshll.u32 %v2592_v11, 16  ;;  %v2291_v49 = vld [vmem:[%s2493_s7 + $0x38] ss:$0 sps:$4 sm:$0x11]  }
  0x2b   : > { %v2589_v10 = vsel %vm756_vm0, %v787_v6, %v788_v7  ;;  %v571_v18 = vshll.u32 %v2599_v14, 16  ;;  %v665_v20 = vshrl.u32 %v2592_v11, 16  ;;  %v672_v22 = vshll.u32 %v2286_v15, 16 }
  0x2c   : > { %742 = vrot.lane.b32.xlu1 %v2552_v48, %s2395_s10  ;;  %v2578_v5 = vsel %vm531_vm1, %v562_v62, %v566_v63  ;;  %v2596_v13 = vsel %vm756_vm0, %v763_v8, %v764_v9  ;;  %v669_v21 = vrot.slane %v667_v16, 1  ;;  %v569_v24 = vshrl.u32 %v2599_v14, 16  ;;  %v2696_v9 = vld [vmem:[%s2493_s7 + $0x9c] sm:$0xff]  }
  0x2d   : > { %740 = vrot.lane.b32.xlu0 %v2557_v51, %s2395_s10  ;;  %v573_v25 = vrot.slane %v571_v18, 1  ;;  %v576_v26 = vshll.u32 %v2287_v17, 16  ;;  %v674_v29 = vrot.slane %v672_v22, 1  ;;  %v1401_v34 = vsel %vm1399_vm2, %v2304_v32, 0 }
  0x2e   : > { %v670_v28 = vor.u32 %v669_v21, %v665_v20  ;;  %v790_v36 = vrot.slane %v2592_v11, 1  ;;  %v791_v37 = vrot.slane %v2286_v15, 1  ;;  %v766_v38 = vrot.slane %v2599_v14, 1  ;;  %v2294_v15 = vld [vmem:[%s2493_s7 + $0xa4] ss:$0 sps:$4 sm:$0x11]  }
  0x2f   : > { %v574_v30 = vor.u32 %v573_v25, %v569_v24  ;;  %v578_v31 = vrot.slane %v576_v26, 1  ;;  %v679_v47 = vshll.u32 %v2655_v43, 16  ;;  %v583_v50 = vshll.u32 %v2660_v44, 16 }
  0x30   : > { %860 = vrot.lane.b32.xlu1 %v2541_v39, %s2393_s8  ;;  %v675_v33 = vsel %vm531_vm1, %v670_v28, %v674_v29  ;;  %v792_v41 = vsel %vm756_vm0, %v790_v36, %v791_v37  ;;  %v684_v52 = vshll.u32 %v2290_v45, 16  ;;  %v677_v53 = vshrl.u32 %v2655_v43, 16 }
  0x31   : > { %844 = vrot.lane.b32.xlu0 %v2547_v46, %s2393_s8  ;;  %v579_v35 = vsel %vm531_vm1, %v574_v30, %v578_v31  ;;  %v681_v54 = vrot.slane %v679_v47, 1  ;;  %v581_v55 = vshrl.u32 %v2660_v44, 16  ;;  %v585_v56 = vrot.slane %v583_v50, 1 }
  0x32   : > { %v588_v57 = vshll.u32 %v2291_v49, 16  ;;  %v686_v58 = vrot.slane %v684_v52, 1  ;;  %v769_v6 = vrot.slane %v2660_v44, 1  ;;  %v770_v7 = vrot.slane %v2291_v49, 1 }
  0x33   : > { %v682_v59 = vor.u32 %v681_v54, %v677_v53  ;;  %v586_v60 = vor.u32 %v585_v56, %v581_v55  ;;  %v691_v16 = vshll.u32 %v2696_v9, 16  ;;  %v689_v19 = vshrl.u32 %v2696_v9, 16  ;;  %v2762_v56 = vld [vmem:[%s2493_s7 + $0xa8] sm:$0xff]  }
  0x34   : > { %905 = vrot.lane.b32.xlu1 %v2552_v48, %s2396_s11  ;;  %v590_v61 = vrot.slane %v588_v57, 1  ;;  %v696_v21 = vshll.u32 %v2294_v15, 16  ;;  %v796_v36 = vrot.slane %v2696_v9, 1  ;;  %v797_v37 = vrot.slane %v2294_v15, 1 }
  0x35   : > { %889 = vrot.lane.b32.xlu0 %v555_v40, %s2396_s11  ;;  %v767_v40 = vrot.slane %v2287_v17, 1  ;;  %v687_v62 = vsel %vm531_vm1, %v682_v59, %v686_v58  ;;  %v2295_v17 = vld [vmem:[%s2493_s7 + $0x44] ss:$0 sps:$4 sm:$0x11]   ;;  %v693_v20 = vrot.slane %v691_v16, 1  ;;  %v2768_v58 = vld [vmem:[%s2493_s7 + $0x48] sm:$0xff]  }
  0x36   : > { %v591_v63 = vsel %vm531_vm1, %v586_v60, %v590_v61  ;;  %v600_v25 = vshll.u32 %v2295_v17, 16  ;;  %v2298_v60 = vld [vmem:[%s2493_s7 + $0xb0] ss:$0 sps:$4 sm:$0x11]   ;;  %v703_v61 = vshll.u32 %v2762_v56, 16  ;;  %v605_v15 = vshrl.u32 %v2768_v58, 16 }
  0x37   : > { %v768_v42 = vsel %vm756_vm0, %v766_v38, %v767_v40  ;;  %v694_v26 = vor.u32 %v693_v20, %v689_v19 }
  0x38   : > { %907 = vrot.lane.b32.xlu1 %v2574_v3, %s2396_s11  ;;  %v602_v29 = vrot.slane %v600_v25, 1 }
  0x39   : > { %891 = vrot.lane.b32.xlu0 %v2578_v5, %s2396_s11 }
  0x3c   : > { %940 = vrot.lane.b32.xlu1 %v2531_v23, %s2397_s12 }
  0x3d   : > { %924 = vrot.lane.b32.xlu0 %v762_v27, %s2397_s12  ;;  %v2301_v27 = vld [vmem:[%s3288_s2 + $0x8] sm:$0xff]  }
  0x3e   : > { %2161 = vmatprep.subr.bf16.mxu0 %v2301_v27  ;;  %2198 = vmatprep.subr.bf16.mxu1 %v2301_v27 }
  0x3f   : > { %2162 = vmatpush3.bf16.msra.mxu0 %v2301_v27  ;;  %2201 = vmatpush3.bf16.msra.mxu1 %v2301_v27  ;;  %v698_v27 = vrot.slane %v696_v21, 1 }
  0x40   : > { %942 = vrot.lane.b32.xlu1 %v2589_v10, %s2397_s12  ;;  %2203 = vmatprep.subr.msk.bf16.mxu0 %vm1399_vm2, %v2304_v32 }
  0x41   : > { %926 = vrot.lane.b32.xlu0 %v2596_v13, %s2397_s12  ;;  %2204 = vmatprep.subr.msk.bf16.mxu1 %vm1399_vm2, %v2304_v32  ;;  %v699_v31 = vsel %vm531_vm1, %v694_v26, %v698_v27 }
  0x43   : > { %2164 = vmatpush3.bf16.msra.mxu0 %v1401_v34  ;;  %2202 = vmatpush3.bf16.msra.mxu1 %v1401_v34 }
  0x44   : > { %977 = vrot.lane.b32.xlu1 %v2541_v39, %s2398_s13 }
  0x45   : > { %961 = vrot.lane.b32.xlu0 %v2547_v46, %s2398_s13 }
  0x48   : > { %979 = vrot.lane.b32.xlu1 %v2592_v11, %s2398_s13 }
  0x49   : > { %963 = vrot.lane.b32.xlu0 %v2599_v14, %s2398_s13 }
  0x4c   : > { %1024 = vrot.lane.b32.xlu1 %v2574_v3, %s2399_s26 }
  0x4d   : > { %1008 = vrot.lane.b32.xlu0 %v2578_v5, %s2399_s26 }
  0x50   : > { %1026 = vrot.lane.b32.xlu1 %v675_v33, %s2399_s26 }
  0x51   : > { %1010 = vrot.lane.b32.xlu0 %v579_v35, %s2399_s26 }
  0x54   : > { %1059 = vrot.lane.b32.xlu1 %v2589_v10, %s2400_s14 }
  0x55   : > { %1043 = vrot.lane.b32.xlu0 %v2596_v13, %s2400_s14 }
  0x58   : > { %744 = vrot.lane.b32.xlu1 %v2574_v3, %s2395_s10  ;;  %v793_v3 = vrot.slane %v2655_v43, 1 }
  0x59   : > { %728 = vrot.lane.b32.xlu0 %v2578_v5, %s2395_s10  ;;  %v794_v5 = vrot.slane %v2290_v45, 1  ;;  %v798_v45 = vsel %vm756_vm0, %v796_v36, %v797_v37  ;;  %v799_v36 = vrot.slane %v2762_v56, 1  ;;  %v800_v37 = vrot.slane %v2298_v60, 1 }
  0x5b   : > { %v795_v8 = vsel %vm756_vm0, %v793_v3, %v794_v5  ;;  %v607_v3 = vshll.u32 %v2768_v58, 16 }
  0x5c   : > { %1061 = vrot.lane.b32.xlu1 %v792_v41, %s2400_s14 }
  0x5d   : > { %1045 = vrot.lane.b32.xlu0 %v768_v42, %s2400_s14  ;;  %v609_v16 = vrot.slane %v607_v3, 1  ;;  %v2824_v3 = vld [vmem:[%s2493_s7 + $0xb4] sm:$0xff]  }
  0x60   : > { %746 = vrot.lane.b32.xlu1 %v675_v33, %s2395_s10 }
  0x61   : > { %730 = vrot.lane.b32.xlu0 %v579_v35, %s2395_s10 }
  0x64   : > { %825 = vrot.lane.b32.xlu1 %v2589_v10, %s2394_s9  ;;  %v771_v10 = vsel %vm756_vm0, %v769_v6, %v770_v7  ;;  %v701_v6 = vshrl.u32 %v2762_v56, 16  ;;  %v705_v7 = vrot.slane %v703_v61, 1 }
  0x65   : > { %809 = vrot.lane.b32.xlu0 %v2596_v13, %s2394_s9  ;;  %v2701_v13 = vld [vmem:[%s2493_s7 + $0x3c] sm:$0xff]  }
  0x66   : > { %v595_v18 = vshll.u32 %v2701_v13, 16  ;;  %v593_v22 = vshrl.u32 %v2701_v13, 16  ;;  %v772_v40 = vrot.slane %v2701_v13, 1  ;;  %v706_v19 = vor.u32 %v705_v7, %v701_v6 }
  0x68   : > { %827 = vrot.lane.b32.xlu1 %v792_v41, %s2394_s9  ;;  %v597_v24 = vrot.slane %v595_v18, 1 }
  0x69   : > { %811 = vrot.lane.b32.xlu0 %v768_v42, %s2394_s9 }
  0x6a   : > { %v598_v28 = vor.u32 %v597_v24, %v593_v22  ;;  %v610_v22 = vor.u32 %v609_v16, %v605_v15 }
  0x6c   : > { %862 = vrot.lane.b32.xlu1 %v2592_v11, %s2393_s8 }
  0x6d   : > { %846 = vrot.lane.b32.xlu0 %v2599_v14, %s2393_s8 }
  0x70   : > { %864 = vrot.lane.b32.xlu1 %v2655_v43, %s2393_s8 }
  0x71   : > { %848 = vrot.lane.b32.xlu0 %v2660_v44, %s2393_s8 }
  0x74   : > { %909 = vrot.lane.b32.xlu1 %v675_v33, %s2396_s11  ;;  %v603_v33 = vsel %vm531_vm1, %v598_v28, %v602_v29 }
  0x75   : > { %893 = vrot.lane.b32.xlu0 %v579_v35, %s2396_s11 }
  0x78   : > { %911 = vrot.lane.b32.xlu1 %v687_v62, %s2396_s11 }
  0x79   : > { %895 = vrot.lane.b32.xlu0 %v591_v63, %s2396_s11 }
  0x7c   : > { %944 = vrot.lane.b32.xlu1 %v792_v41, %s2397_s12  ;;  %v773_v41 = vrot.slane %v2295_v17, 1 }
  0x7d   : > { %928 = vrot.lane.b32.xlu0 %v768_v42, %s2397_s12 }
  0x7e   : > { %v2747_v49 = vsel %vm756_vm0, %v772_v40, %v773_v41 }
  0x80   : > { %946 = vrot.lane.b32.xlu1 %v795_v8, %s2397_s12 }
  0x81   : > { %930 = vrot.lane.b32.xlu0 %v771_v10, %s2397_s12 }
  0x84   : > { %981 = vrot.lane.b32.xlu1 %v2655_v43, %s2398_s13 }
  0x85   : > { %965 = vrot.lane.b32.xlu0 %v2660_v44, %s2398_s13 }
  0x88   : > { %983 = vrot.lane.b32.xlu1 %v2696_v9, %s2398_s13 }
  0x89   : > { %967 = vrot.lane.b32.xlu0 %v2701_v13, %s2398_s13 }
  0x8c   : > { %1028 = vrot.lane.b32.xlu1 %v687_v62, %s2399_s26 }
  0x8d   : > { %1012 = vrot.lane.b32.xlu0 %v591_v63, %s2399_s26 }
  0x8e   : > { %v2720_v30 = vpop.permute.xlu1 %858 }
  0x8f   : > { %v2724_v32 = vpop.permute.xlu0 %842 }
  0x90   : > { %1030 = vrot.lane.b32.xlu1 %v699_v31, %s2399_s26 }
  0x91   : > { %1014 = vrot.lane.b32.xlu0 %v603_v33, %s2399_s26 }
  0x92   : > { %v2729_v34 = vpop.permute.xlu1 %821 }
  0x93   : > { %v2731_v35 = vpop.permute.xlu0 %805 }
  0x94   : > { %1063 = vrot.lane.b32.xlu1 %v795_v8, %s2400_s14 }
  0x95   : > { %1047 = vrot.lane.b32.xlu0 %v771_v10, %s2400_s14 }
  0x96   : > { %v2736_v38 = vpop.permute.xlu1 %823 }
  0x97   : > { %v2739_v42 = vpop.permute.xlu0 %807 }
  0x98   : > { %748 = vrot.lane.b32.xlu1 %v687_v62, %s2395_s10 }
  0x99   : > { %732 = vrot.lane.b32.xlu0 %v591_v63, %s2395_s10  ;;  %v2299_v63 = vld [vmem:[%s2493_s7 + $0x50] ss:$0 sps:$4 sm:$0x11]  }
  0x9a   : > { %v2744_v47 = vpop.permute.xlu1 %726  ;;  %v612_v17 = vshll.u32 %v2299_v63, 16  ;;  %v776_v40 = vrot.slane %v2299_v63, 1 }
  0x9b   : > { %v725_v50 = vpop.permute.xlu0 %724 }
  0x9c   : > { %1065 = vrot.lane.b32.xlu1 %v798_v45, %s2400_s14  ;;  %v614_v24 = vrot.slane %v612_v17, 1  ;;  %v1077_v6 = vsel %vm1075_vm3, %v2510_v4, %v725_v50 }
  0x9d   : > { %1049 = vrot.lane.b32.xlu0 %v2747_v49, %s2400_s14  ;;  %v1110_v4 = vsel %vm1108_vm4, %v1077_v6, %v2731_v35  ;;  %v2853_v35 = vld [vmem:[%s2493_s7 + $0x5c] ss:$0 sps:$4 sm:$0x11]  }
  0x9e   : > { %v2752_v52 = vpop.permute.xlu1 %742  ;;  %v2805_v28 = vsel %vm531_vm1, %v610_v22, %v614_v24  ;;  %v713_v22 = vshrl.u32 %v2824_v3, 16 }
  0x9f   : > { %v741_v53 = vpop.permute.xlu0 %740 }
  0xa0   : > { %750 = vrot.lane.b32.xlu1 %v699_v31, %s2395_s10  ;;  %v1093_v41 = vsel %vm1075_vm3, %v2506_v2, %v741_v53 }
  0xa1   : > { %734 = vrot.lane.b32.xlu0 %v603_v33, %s2395_s10  ;;  %v1126_v53 = vsel %vm1108_vm4, %v1093_v41, %v2729_v34  ;;  %v715_v34 = vshll.u32 %v2824_v3, 16 }
  0xa2   : > { %v2756_v54 = vpop.permute.xlu1 %860  ;;  %v1159_v50 = vsel %vm1141_vm6, %v1126_v53, %v2720_v30  ;;  %v624_v53 = vshll.u32 %v2853_v35, 16 }
  0xa3   : > { %v2758_v55 = vpop.permute.xlu0 %844 }
  0xa4   : > { %829 = vrot.lane.b32.xlu1 %v795_v8, %s2394_s9  ;;  %v708_v8 = vshll.u32 %v2298_v60, 16  ;;  %v2821_v60 = vsel %vm756_vm0, %v799_v36, %v800_v37  ;;  %v717_v36 = vrot.slane %v715_v34, 1 }
  0xa5   : > { %813 = vrot.lane.b32.xlu0 %v771_v10, %s2394_s9 }
  0xa6   : > { %v2765_v57 = vpop.permute.xlu1 %905  ;;  %v710_v20 = vrot.slane %v708_v8, 1 }
  0xa7   : > { %v2770_v59 = vpop.permute.xlu0 %889  ;;  %v1192_v16 = vsel %vm1174_vm5, %v1159_v50, %v2765_v57 }
  0xa8   : > { %831 = vrot.lane.b32.xlu1 %v798_v45, %s2394_s9  ;;  %v2801_v26 = vsel %vm531_vm1, %v706_v19, %v710_v20  ;;  %v1143_v19 = vsel %vm1141_vm6, %v1110_v4, %v2724_v32  ;;  %v1095_v32 = vsel %vm1075_vm3, %v2496_v0, %v2752_v52  ;;  %v1079_v0 = vsel %vm1075_vm3, %v2499_v1, %v2744_v47 }
  0xa9   : > { %815 = vrot.lane.b32.xlu0 %v2747_v49, %s2394_s9  ;;  %v1176_v57 = vsel %vm1174_vm5, %v1143_v19, %v2770_v59  ;;  %v718_v4 = vor.u32 %v717_v36, %v713_v22  ;;  %v1112_v47 = vsel %vm1108_vm4, %v1079_v0, %v2739_v42 }
  0xaa   : > { %v2777_v62 = vpop.permute.xlu1 %907 }
  0xab   : > { %v2781_v5 = vpop.permute.xlu0 %891 }
  0xac   : > { %866 = vrot.lane.b32.xlu1 %v2696_v9, %s2393_s8 }
  0xad   : > { %850 = vrot.lane.b32.xlu0 %v2701_v13, %s2393_s8 }
  0xae   : > { %v941_v10 = vpop.permute.xlu1 %940 }
  0xaf   : > { %v2789_v18 = vpop.permute.xlu0 %924  ;;  %v1225_v20 = vsel %vm1207_vm7, %v1192_v16, %v941_v10  ;;  %v626_v16 = vrot.slane %v624_v53, 1  ;;  %v2307_v53 = vld [vmem:[%s2679_s5] sm:$0xff]  }
  0xb0   : > { %868 = vrot.lane.b32.xlu1 %v2762_v56, %s2393_s8  ;;  %v1209_v10 = vsel %vm1207_vm7, %v1176_v57, %v2789_v18 }
  0xb1   : > { %852 = vrot.lane.b32.xlu0 %v2768_v58, %s2393_s8 }
  0xb2   : > { %v2795_v21 = vpop.permute.xlu1 %942 }
  0xb3   : > { %v2797_v25 = vpop.permute.xlu0 %926 }
  0xb4   : > { %913 = vrot.lane.b32.xlu1 %v699_v31, %s2396_s11 }
  0xb5   : > { %897 = vrot.lane.b32.xlu0 %v603_v33, %s2396_s11  ;;  %v775_v33 = vrot.slane %v2768_v58, 1 }
  0xb6   : > { %v978_v27 = vpop.permute.xlu1 %977 }
  0xb7   : > { %v962_v29 = vpop.permute.xlu0 %961  ;;  %v2833_v7 = vsel %vm756_vm0, %v775_v33, %v776_v40  ;;  %v1258_v24 = vsel %vm1240_vm8, %v1225_v20, %v978_v27 }
  0xb8   : > { %915 = vrot.lane.b32.xlu1 %v2801_v26, %s2396_s11  ;;  %v1242_v27 = vsel %vm1240_vm8, %v1209_v10, %v962_v29  ;;  %v1128_v29 = vsel %vm1108_vm4, %v1095_v32, %v2736_v38 }
  0xb9   : > { %899 = vrot.lane.b32.xlu0 %v2805_v28, %s2396_s11  ;;  %v1161_v50 = vsel %vm1141_vm6, %v1128_v29, %v2756_v54  ;;  %v880_v29 = vshll.u32 %v2307_v53, 16 }
  0xba   : > { %v2812_v31 = vpop.permute.xlu1 %979  ;;  %v1194_v38 = vsel %vm1174_vm5, %v1161_v50, %v2777_v62 }
  0xbb   : > { %v2817_v61 = vpop.permute.xlu0 %963  ;;  %v1227_v54 = vsel %vm1207_vm7, %v1194_v38, %v2795_v21 }
  0xbc   : > { %948 = vrot.lane.b32.xlu1 %v798_v45, %s2397_s12  ;;  %v2836_v45 = vld [vmem:[%s2493_s7 + $0x54] sm:$0xff]   ;;  %v1260_v42 = vsel %vm1240_vm8, %v1227_v54, %v2812_v31 }
  0xbd   : > { %932 = vrot.lane.b32.xlu0 %v2747_v49, %s2397_s12  ;;  %v2843_v49 = vld [vmem:[%s2493_s7 + $0xbc] ss:$0 sps:$4 sm:$0x11]   ;;  %v619_v17 = vshll.u32 %v2836_v45, 16  ;;  %v617_v59 = vshrl.u32 %v2836_v45, 16  ;;  %v778_v10 = vrot.slane %v2836_v45, 1 }
  0xbe   : > { %v1025_v63 = vpop.permute.xlu1 %1024  ;;  %v720_v37 = vshll.u32 %v2843_v49, 16 }
  0xbf   : > { %v1009_v8 = vpop.permute.xlu0 %1008  ;;  %v1291_v33 = vsel %vm1273_vm9, %v1258_v24, %v1025_v63  ;;  %v621_v6 = vrot.slane %v619_v17, 1  ;;  %v1145_v17 = vsel %vm1141_vm6, %v1112_v47, %v2758_v55 }
  0xc0   : > { %950 = vrot.lane.b32.xlu1 %v2821_v60, %s2397_s12  ;;  %v1275_v52 = vsel %vm1273_vm9, %v1242_v27, %v1009_v8  ;;  %v722_v34 = vrot.slane %v720_v37, 1  ;;  %v1178_v20 = vsel %vm1174_vm5, %v1145_v17, %v2781_v5  ;;  %v803_v37 = vrot.slane %v2843_v49, 1 }
  0xc1   : > { %934 = vrot.lane.b32.xlu0 %v2833_v7, %s2397_s12  ;;  %v622_v8 = vor.u32 %v621_v6, %v617_v59  ;;  %v1211_v22 = vsel %vm1207_vm7, %v1178_v20, %v2797_v25 }
  0xc2   : > { %v1027_v15 = vpop.permute.xlu1 %1026  ;;  %v723_v62 = vsel %vm531_vm1, %v718_v4, %v722_v34  ;;  %v1244_v57 = vsel %vm1240_vm8, %v1211_v22, %v2817_v61  ;;  %v882_v34 = vrot.slane %v880_v29, 1  ;;  %v921_v22 = vrot.slane %v2307_v53, 1 }
  0xc3   : > { %v1011_v30 = vpop.permute.xlu0 %1010  ;;  %v1293_v55 = vsel %vm1273_vm9, %v1260_v42, %v1027_v15  ;;  %v627_v5 = vsel %vm531_vm1, %v622_v8, %v626_v16 }
  0xc4   : > { %985 = vrot.lane.b32.xlu1 %v2762_v56, %s2398_s13  ;;  %v1277_v31 = vsel %vm1273_vm9, %v1244_v57, %v1011_v30  ;;  %v802_v30 = vrot.slane %v2824_v3, 1  ;;  %v2998_v57 = vld [vmem:[%s2679_s5 + $0xc] sm:$0xff]  }
  0xc5   : > { %969 = vrot.lane.b32.xlu0 %v2768_v58, %s2398_s13 }
  0xc6   : > { %v1060_v40 = vpop.permute.xlu1 %1059  ;;  %v804_v59 = vsel %vm756_vm0, %v802_v30, %v803_v37  ;;  %v999_v30 = vshll.u32 %v2998_v57, 16 }
  0xc7   : > { %v1324_v41 = vsel %vm1306_vm10, %v1291_v33, %v1060_v40  ;;  %v1044_v18 = vpop.permute.xlu0 %1043  ;;  %v779_v33 = vrot.slane %v2853_v35, 1 }
  0xc8   : > { %987 = vrot.lane.b32.xlu1 %v2824_v3, %s2398_s13  ;;  %2181 = vmatprep.mubr.msk.bf16.mxu1 %vm1366_vm11, %v1324_v41  ;;  %v1308_v63 = vsel %vm1306_vm10, %v1275_v52, %v1044_v18  ;;  %v2308_v18 = vld [vmem:[%s2679_s5 + $0x8] ss:$0 sps:$4 sm:$0x11]  }
  0xc9   : > { %971 = vrot.lane.b32.xlu0 %v2836_v45, %s2398_s13  ;;  %2165 = vmatprep.mubr.msk.bf16.mxu0 %vm1366_vm11, %v1308_v63  ;;  %v780_v27 = vsel %vm756_vm0, %v778_v10, %v779_v33  ;;  %v885_v50 = vshll.u32 %v2308_v18, 16 }
  0xca   : > { %v2893_v1 = vpop.permute.xlu1 %744 }
  0xcb   : > { %v2903_v19 = vpop.permute.xlu0 %728  ;;  %v887_v8 = vrot.slane %v885_v50, 1 }
  0xcc   : > { %1032 = vrot.lane.b32.xlu1 %v2801_v26, %s2399_s26  ;;  %v1081_v37 = vsel %vm1075_vm3, %v2547_v46, %v2903_v19  ;;  %v997_v46 = vshrl.u32 %v2998_v57, 16 }
  0xcd   : > { %1016 = vrot.lane.b32.xlu0 %v2805_v28, %s2399_s26 }
  0xce   : > { %v1062_v21 = vpop.permute.xlu1 %1061 }
  0xcf   : > { %v1326_v24 = vsel %vm1306_vm10, %v1293_v55, %v1062_v21  ;;  %v1046_v36 = vpop.permute.xlu0 %1045 }
  0xd0   : > { %1034 = vrot.lane.b32.xlu1 %v723_v62, %s2399_s26  ;;  %2182 = vmatmul.mubr.msk.bf16.vlgmr.msra.gmra.mrb[0].mxu1 %vm1366_vm11, %v1326_v24  ;;  %v1310_v25 = vsel %vm1306_vm10, %v1277_v31, %v1046_v36 }
  0xd1   : > { %1018 = vrot.lane.b32.xlu0 %v627_v5, %s2399_s26  ;;  %2166 = vmatmul.mubr.msk.bf16.vlgmr.msra.gmra.mrb[0].mxu0 %vm1366_vm11, %v1310_v25  ;;  %v3008_v25 = vld [vmem:[%s2679_s5 + $0x14] ss:$0 sps:$4 sm:$0x11]  }
  0xd2   : > { %v2927_v15 = vpop.permute.xlu1 %746  ;;  %v1004_v29 = vshll.u32 %v3008_v25, 16 }
  0xd3   : > { %v2929_v61 = vpop.permute.xlu0 %730 }
  0xd4   : > { %1067 = vrot.lane.b32.xlu1 %v2821_v60, %s2400_s14 }
  0xd5   : > { %1051 = vrot.lane.b32.xlu0 %v2833_v7, %s2400_s14 }
  0xd6   : > { %v826_v32 = vpop.permute.xlu1 %825 }
  0xd7   : > { %v2939_v40 = vpop.permute.xlu0 %809 }
  0xd8   : > { %752 = vrot.lane.b32.xlu1 %v2801_v26, %s2395_s10 }
  0xd9   : > { %736 = vrot.lane.b32.xlu0 %v2805_v28, %s2395_s10 }
  0xda   : > { %v2946_v49 = vpop.permute.xlu1 %827 }
  0xdb   : > { %v2949_v41 = vpop.permute.xlu0 %811 }
  0xdc   : > { %1069 = vrot.lane.b32.xlu1 %v804_v59, %s2400_s14 }
  0xdd   : > { %1053 = vrot.lane.b32.xlu0 %v780_v27, %s2400_s14 }
  0xde   : > { %v863_v35 = vpop.permute.xlu1 %862 }
  0xdf   : > { %v847_v6 = vpop.permute.xlu0 %846 }
  0xe0   : > { %754 = vrot.lane.b32.xlu1 %v723_v62, %s2395_s10 }
  0xe1   : > { %738 = vrot.lane.b32.xlu0 %v627_v5, %s2395_s10 }
  0xe2   : > { %v2955_v26 = vpop.permute.xlu1 %864 }
  0xe3   : > { %v2957_v28 = vpop.permute.xlu0 %848 }
  0xe4   : > { %833 = vrot.lane.b32.xlu1 %v2821_v60, %s2394_s9  ;;  %v878_v60 = vshrl.u32 %v2307_v53, 16 }
  0xe5   : > { %817 = vrot.lane.b32.xlu0 %v2833_v7, %s2394_s9 }
  0xe6   : > { %v910_v0 = vpop.permute.xlu1 %909  ;;  %v883_v38 = vor.u32 %v882_v34, %v878_v60  ;;  %v2311_v60 = vld [vmem:[%s2493_s7 + $0x60] sm:$0xff]  }
  0xe7   : > { %v894_v52 = vpop.permute.xlu0 %893 }
  0xe8   : > { %835 = vrot.lane.b32.xlu1 %v804_v59, %s2394_s9  ;;  %v2984_v54 = vsel %vm531_vm1, %v883_v38, %v887_v8 }
  0xe9   : > { %819 = vrot.lane.b32.xlu0 %v780_v27, %s2394_s9 }
  0xea   : > { %v2967_v63 = vpop.permute.xlu1 %911 }
  0xeb   : > { %v2969_v4 = vpop.permute.xlu0 %895 }
  0xec   : > { %870 = vrot.lane.b32.xlu1 %v2824_v3, %s2393_s8 }
  0xed   : > { %854 = vrot.lane.b32.xlu0 %v2836_v45, %s2393_s8 }
  0xee   : > { %v945_v7 = vpop.permute.xlu1 %944 }
  0xef   : > { %v929_v47 = vpop.permute.xlu0 %928 }
  0xf0   : > { %872 = vrot.lane.b32.xlu1 %v2307_v53, %s2393_s8 }
  0xf1   : > { %856 = vrot.lane.b32.xlu0 %v2506_v2, %s2393_s8  ;;  %v922_v2 = vrot.slane %v2308_v18, 1  ;;  %v1001_v18 = vrot.slane %v999_v30, 1  ;;  %v1041_v30 = vrot.slane %v3008_v25, 1 }
  0xf2   : > { %v2978_v16 = vpop.permute.xlu1 %946 }
  0xf3   : > { %v2980_v17 = vpop.permute.xlu0 %930  ;;  %v1002_v8 = vor.u32 %v1001_v18, %v997_v46 }
  0xf4   : > { %917 = vrot.lane.b32.xlu1 %v723_v62, %s2396_s11  ;;  %v2995_v62 = vsel %vm756_vm0, %v921_v22, %v922_v2 }
  0xf5   : > { %901 = vrot.lane.b32.xlu0 %v627_v5, %s2396_s11  ;;  %v1097_v5 = vsel %vm1075_vm3, %v2541_v39, %v2893_v1  ;;  %v1114_v1 = vsel %vm1108_vm4, %v1081_v37, %v2939_v40 }
  0xf6   : > { %v982_v20 = vpop.permute.xlu1 %981  ;;  %v1130_v36 = vsel %vm1108_vm4, %v1097_v5, %v826_v32  ;;  %v1147_v33 = vsel %vm1141_vm6, %v1114_v1, %v847_v6 }
  0xf7   : > { %v966_v42 = vpop.permute.xlu0 %965  ;;  %v1163_v10 = vsel %vm1141_vm6, %v1130_v36, %v863_v35  ;;  %v1180_v19 = vsel %vm1174_vm5, %v1147_v33, %v894_v52  ;;  %v1099_v52 = vsel %vm1075_vm3, %v2592_v11, %v2927_v15  ;;  %v2312_v15 = vld [vmem:[%s2493_s7 + $0x6c] sm:$0xff]   ;;  %s301_s7 = sand.u32 1, %s2375_s16  }
  0xf8   : > { %919 = vrot.lane.b32.xlu1 %v2984_v54, %s2396_s11  ;;  %v1196_v32 = vsel %vm1174_vm5, %v1163_v10, %v910_v0  ;;  %v1213_v40 = vsel %vm1207_vm7, %v1180_v19, %v929_v47  ;;  %v1132_v47 = vsel %vm1108_vm4, %v1099_v52, %v2946_v49  ;;  %s1914_s8 = sshll.u32 %s301_s7, 7 }
  0xf9   : > { %903 = vrot.lane.b32.xlu0 %v2557_v51, %s2396_s11  ;;  %v1165_v11 = vsel %vm1141_vm6, %v1132_v47, %v2955_v26  ;;  %s3186_s9 = scalar_lea.vmem [#allocation2], %s1914_s8  ;;  %s2044_s11 = sshll.u32 %s2383_s18, 11 }
  0xfa   : > { %v984_v55 = vpop.permute.xlu1 %983  ;;  %v1198_v2 = vsel %vm1174_vm5, %v1165_v11, %v2967_v63  ;;  %s3230_s6 = scalar_lea.hbm %s3290_s4, %s2044_s11  ;;  %s3239_s18 = scalar_lea.sflag [#allocation3], %s301_s7 }
  0xfb   : > { %v2991_v21 = vpop.permute.xlu0 %967 }
  0xfc   : > { %952 = vrot.lane.b32.xlu1 %v804_v59, %s2397_s12  ;;  %v1229_v59 = vsel %vm1207_vm7, %v1196_v32, %v945_v7 }
  0xfd   : > { %936 = vrot.lane.b32.xlu0 %v780_v27, %s2397_s12  ;;  %v1262_v35 = vsel %vm1240_vm8, %v1229_v59, %v982_v20  ;;  %v1006_v20 = vrot.slane %v1004_v29, 1 }
  0xfe   : > { %v1029_v24 = vpop.permute.xlu1 %1028 }
  0xff   : > { %v1013_v31 = vpop.permute.xlu0 %1012  ;;  %v1295_v0 = vsel %vm1273_vm9, %v1262_v35, %v1029_v24 }
 0x100   : > { %954 = vrot.lane.b32.xlu1 %v2995_v62, %s2397_s12 }
 0x101   : > { %938 = vrot.lane.b32.xlu0 %v2519_v12, %s2397_s12  ;;  %s1773_s12 = sshll.u32 %s3186_s9, 4  ;;  %s3233_s12 = int_to_ptr.vmem [resolvable:$true] %s1773_s12 }
 0x102   : > { %v1031_v39 = vpop.permute.xlu1 %1030  ;;  %p2320_p1 = scmp.lt.s32.totalorder %s3233_s12, %s2318_s22 }
 0x103   : > { %v1015_v27 = vpop.permute.xlu0 %1014 }
 0x104   : > { %989 = vrot.lane.b32.xlu1 %v2307_v53, %s2398_s13  ;;  %v1246_v53 = vsel %vm1240_vm8, %v1213_v40, %v966_v42  ;;  %v1083_v42 = vsel %vm1075_vm3, %v2599_v14, %v2929_v61  ;;  %v1231_v14 = vsel %vm1207_vm7, %v1198_v2, %v2978_v16 }
 0x105   : > { %973 = vrot.lane.b32.xlu0 %v2311_v60, %s2398_s13  ;;  %v1279_v50 = vsel %vm1273_vm9, %v1246_v53, %v1013_v31  ;;  %v1116_v49 = vsel %vm1108_vm4, %v1083_v42, %v2949_v41  ;;  %v1264_v5 = vsel %vm1240_vm8, %v1231_v14, %v984_v55  ;;  %v1007_v41 = vsel %vm531_vm1, %v1002_v8, %v1006_v20 }
 0x106   : > { %v1064_v6 = vpop.permute.xlu1 %1063  ;;  %v1149_v24 = vsel %vm1141_vm6, %v1116_v49, %v2957_v28  ;;  %v1297_v31 = vsel %vm1273_vm9, %v1264_v5, %v1031_v39  ;;  %v1040_v55 = vrot.slane %v2998_v57, 1 }
 0x107   : > { %v1328_v34 = vsel %vm1306_vm10, %v1295_v0, %v1064_v6  ;;  %v1048_v7 = vpop.permute.xlu0 %1047  ;;  %v1182_v26 = vsel %vm1174_vm5, %v1149_v24, %v2969_v4 }
 0x108   : > { %991 = vrot.lane.b32.xlu1 %v2998_v57, %s2398_s13  ;;  %2185 = vmatprep.mubr.msk.bf16.mxu1 %vm1366_vm11, %v1328_v34  ;;  %v1312_v38 = vsel %vm1306_vm10, %v1279_v50, %v1048_v7  ;;  %v1215_v63 = vsel %vm1207_vm7, %v1182_v26, %v2980_v17  ;;  %v1042_v37 = vsel %vm756_vm0, %v1040_v55, %v1041_v30 }
 0x109   : > { %975 = vrot.lane.b32.xlu0 %v2312_v15, %s2398_s13  ;;  %2169 = vmatprep.mubr.msk.bf16.mxu0 %vm1366_vm11, %v1312_v38  ;;  %v1248_v16 = vsel %vm1240_vm8, %v1215_v63, %v2991_v21 }
 0x10a   : > { %v749_v22 = vpop.permute.xlu1 %748  ;;  %v1281_v4 = vsel %vm1273_vm9, %v1248_v16, %v1015_v27 }
 0x10b   : > { %v733_v61 = vpop.permute.xlu0 %732 }
 0x10c   : > { %1036 = vrot.lane.b32.xlu1 %v2984_v54, %s2399_s26  ;;  %v1085_v52 = vsel %vm1075_vm3, %v2660_v44, %v733_v61 }
 0x10d   : > { %1020 = vrot.lane.b32.xlu0 %v2557_v51, %s2399_s26 }
 0x10e   : > { %v1066_v28 = vpop.permute.xlu1 %1065 }
 0x10f   : > { %v1330_v54 = vsel %vm1306_vm10, %v1297_v31, %v1066_v28  ;;  %v1050_v36 = vpop.permute.xlu0 %1049 }
 0x110   : > { %1038 = vrot.lane.b32.xlu1 %v1007_v41, %s2399_s26  ;;  %2186 = vmatmul.mubr.msk.bf16.gmra.mrb[4].mxu1 %vm1366_vm11, %v1330_v54  ;;  %v1314_v17 = vsel %vm1306_vm10, %v1281_v4, %v1050_v36 }
 0x111   : > { %1022 = vrot.lane.b32.xlu0 %v2552_v48, %s2399_s26  ;;  %2170 = vmatmul.mubr.msk.bf16.gmra.mrb[4].mxu0 %vm1366_vm11, %v1314_v17 }
 0x112   : > { %v751_v51 = vpop.permute.xlu1 %750 }
 0x113   : > { %v735_v21 = vpop.permute.xlu0 %734  ;;  %v1103_v24 = vsel %vm1075_vm3, %v2696_v9, %v751_v51 }
 0x114   : > { %1071 = vrot.lane.b32.xlu1 %v2995_v62, %s2400_s14  ;;  %v1087_v41 = vsel %vm1075_vm3, %v2701_v13, %v735_v21 }
 0x115   : > { %1055 = vrot.lane.b32.xlu0 %v2519_v12, %s2400_s14 }
 0x116   : > { %v830_v10 = vpop.permute.xlu1 %829 }
 0x117   : > { %v814_v39 = vpop.permute.xlu0 %813 }
 0x118   : > { %1073 = vrot.lane.b32.xlu1 %v1042_v37, %s2400_s14  ;;  %v1118_v47 = vsel %vm1108_vm4, %v1085_v52, %v814_v39 }
 0x119   : > { %1057 = vrot.lane.b32.xlu0 %v2531_v23, %s2400_s14  ;;  %v1101_v23 = vsel %vm1075_vm3, %v2655_v43, %v749_v22  ;;  %s2313_s14 = scalar_lea.vmem %s3233_s12, 2048 }
 0x11a   : > { %v832_v48 = vpop.permute.xlu1 %831  ;;  %v1134_v34 = vsel %vm1108_vm4, %v1101_v23, %v830_v10  ;;  %p2314_p12 = scmp.ne.s32.totalorder %s3233_s12, %s2313_s14  ;;  %p2321_p2 = scmp.lt.s32.totalorder %s2319_s24, %s2313_s14 }
 0x11b   : > { %v816_v57 = vpop.permute.xlu0 %815  ;;  %v1136_v26 = vsel %vm1108_vm4, %v1103_v24, %v832_v48 }
 0x11c   : > { %v1120_v28 = vsel %vm1108_vm4, %v1087_v41, %v816_v57  ;;  %p2315_p13 = pnand %p2314_p12, %p2468_p4  ;;  %p2322_p3 = por %p2321_p2, %p2320_p1 }
 0x11e   : > { %v867_v25 = vpop.permute.xlu1 %866  ;;  %p2316_p0 = pneg %p2315_p13 }
 0x11f   : > { %v851_v1 = vpop.permute.xlu0 %850  ;;  %v1167_v50 = vsel %vm1141_vm6, %v1134_v34, %v867_v25 }
 0x120   : > { %v1151_v8 = vsel %vm1141_vm6, %v1118_v47, %v851_v1  ;;  %p2323_p5 = pnand %p2322_p3, %p2316_p0 }
 0x122   : > { %v869_v32 = vpop.permute.xlu1 %868 }
 0x123   : > { %v853_v33 = vpop.permute.xlu0 %852  ;;  %v1169_v63 = vsel %vm1141_vm6, %v1136_v26, %v869_v32 }
 0x124   : > { %v1153_v16 = vsel %vm1141_vm6, %v1120_v28, %v853_v33 }
 0x126   : > { %v914_v59 = vpop.permute.xlu1 %913 }
 0x127   : > { %v898_v62 = vpop.permute.xlu0 %897  ;;  %v1200_v38 = vsel %vm1174_vm5, %v1167_v50, %v914_v59 }
 0x128   : > { %v1184_v43 = vsel %vm1174_vm5, %v1151_v8, %v898_v62 }
 0x12a   : > { %v916_v27 = vpop.permute.xlu1 %915 }
 0x12b   : > { %v900_v46 = vpop.permute.xlu0 %899  ;;  %v1202_v9 = vsel %vm1174_vm5, %v1169_v63, %v916_v27 }
 0x12c   : > { %v1186_v36 = vsel %vm1174_vm5, %v1153_v16, %v900_v46 }
 0x12e   : > { %v949_v19 = vpop.permute.xlu1 %948 }
 0x12f   : > { %v933_v35 = vpop.permute.xlu0 %932  ;;  %v1233_v20 = vsel %vm1207_vm7, %v1200_v38, %v949_v19 }
 0x130   : > { %v1217_v15 = vsel %vm1207_vm7, %v1184_v43, %v933_v35 }
 0x132   : > { %v951_v12 = vpop.permute.xlu1 %950 }
 0x133   : > { %v935_v18 = vpop.permute.xlu0 %934  ;;  %v1235_v54 = vsel %vm1207_vm7, %v1202_v9, %v951_v12 }
 0x134   : > { %v1219_v13 = vsel %vm1207_vm7, %v1186_v36, %v935_v18 }
 0x136   : > { %v986_v29 = vpop.permute.xlu1 %985 }
 0x137   : > { %v970_v40 = vpop.permute.xlu0 %969  ;;  %v1266_v11 = vsel %vm1240_vm8, %v1233_v20, %v986_v29 }
 0x138   : > { %v1250_v49 = vsel %vm1240_vm8, %v1217_v15, %v970_v40 }
 0x13a   : > { %v988_v0 = vpop.permute.xlu1 %987 }
 0x13b   : > { %v972_v60 = vpop.permute.xlu0 %971  ;;  %v1268_v17 = vsel %vm1240_vm8, %v1235_v54, %v988_v0 }
 0x13c   : > { %v1252_v51 = vsel %vm1240_vm8, %v1219_v13, %v972_v60 }
 0x13e   : > { %v1033_v6 = vpop.permute.xlu1 %1032 }
 0x13f   : > { %v1017_v53 = vpop.permute.xlu0 %1016  ;;  %v1299_v44 = vsel %vm1273_vm9, %v1266_v11, %v1033_v6 }
 0x140   : > { %v1283_v14 = vsel %vm1273_vm9, %v1250_v49, %v1017_v53 }
 0x142   : > { %v1035_v7 = vpop.permute.xlu1 %1034 }
 0x143   : > { %v1019_v42 = vpop.permute.xlu0 %1018  ;;  %v1301_v55 = vsel %vm1273_vm9, %v1268_v17, %v1035_v7 }
 0x144   : > { %v1285_v37 = vsel %vm1273_vm9, %v1252_v51, %v1019_v42 }
 0x146   : > { %v1068_v22 = vpop.permute.xlu1 %1067 }
 0x147   : > { %v1332_v2 = vsel %vm1306_vm10, %v1299_v44, %v1068_v22  ;;  %v1052_v61 = vpop.permute.xlu0 %1051 }
 0x148   : > { %2189 = vmatprep.mubr.msk.bf16.mxu1 %vm1366_vm11, %v1332_v2  ;;  %v1316_v5 = vsel %vm1306_vm10, %v1283_v14, %v1052_v61 }
 0x149   : > { %2173 = vmatprep.mubr.msk.bf16.mxu0 %vm1366_vm11, %v1316_v5 }
 0x14a   : > { %v753_v31 = vpop.permute.xlu1 %752 }
 0x14b   : > { %v737_v4 = vpop.permute.xlu0 %736  ;;  %v1105_v50 = vsel %vm1075_vm3, %v2762_v56, %v753_v31 }
 0x14c   : > { %v1089_v38 = vsel %vm1075_vm3, %v2768_v58, %v737_v4 }
 0x14e   : > { %v1070_v30 = vpop.permute.xlu1 %1069 }
 0x14f   : > { %v1334_v21 = vsel %vm1306_vm10, %v1301_v55, %v1070_v30  ;;  %v1054_v10 = vpop.permute.xlu0 %1053 }
 0x150   : > { %2190 = vmatmul.mubr.msk.bf16.gmra.mrb[8].mxu1 %vm1366_vm11, %v1334_v21  ;;  %v1318_v39 = vsel %vm1306_vm10, %v1285_v37, %v1054_v10  ;;  %v3173_v10 = vld [vmem:[%s3289_s3] ss:$0 sm:$0xff] }
 0x151   : > { %2174 = vmatmul.mubr.msk.bf16.gmra.mrb[8].mxu0 %vm1366_vm11, %v1318_v39 }
 0x152   : > { %v755_v48 = vpop.permute.xlu1 %754 }
 0x153   : > { %v739_v57 = vpop.permute.xlu0 %738  ;;  %v1107_v11 = vsel %vm1075_vm3, %v2824_v3, %v755_v48 }
 0x154   : > { %v1091_v2 = vsel %vm1075_vm3, %v2836_v45, %v739_v57 }
 0x156   : > { %v834_v25 = vpop.permute.xlu1 %833 }
 0x157   : > { %v818_v1 = vpop.permute.xlu0 %817  ;;  %v1138_v47 = vsel %vm1108_vm4, %v1105_v50, %v834_v25 }
 0x158   : > { %v1122_v42 = vsel %vm1108_vm4, %v1089_v38, %v818_v1 }
 0x15a   : > { %v836_v32 = vpop.permute.xlu1 %835 }
 0x15b   : > { %v820_v33 = vpop.permute.xlu0 %819  ;;  %v1140_v22 = vsel %vm1108_vm4, %v1107_v11, %v836_v32 }
 0x15c   : > { %v1124_v26 = vsel %vm1108_vm4, %v1091_v2, %v820_v33 }
 0x15e   : > { %v871_v59 = vpop.permute.xlu1 %870 }
 0x15f   : > { %v855_v62 = vpop.permute.xlu0 %854  ;;  %v1171_v8 = vsel %vm1141_vm6, %v1138_v47, %v871_v59 }
 0x160   : > { %v1155_v15 = vsel %vm1141_vm6, %v1122_v42, %v855_v62 }
 0x162   : > { %v873_v27 = vpop.permute.xlu1 %872 }
 0x163   : > { %v857_v46 = vpop.permute.xlu0 %856  ;;  %v1173_v24 = vsel %vm1141_vm6, %v1140_v22, %v873_v27 }
 0x164   : > { %v1157_v31 = vsel %vm1141_vm6, %v1124_v26, %v857_v46 }
 0x166   : > { %v918_v19 = vpop.permute.xlu1 %917 }
 0x167   : > { %v902_v35 = vpop.permute.xlu0 %901  ;;  %v1204_v43 = vsel %vm1174_vm5, %v1171_v8, %v918_v19 }
 0x168   : > { %v1188_v49 = vsel %vm1174_vm5, %v1155_v15, %v902_v35 }
 0x16a   : > { %v920_v12 = vpop.permute.xlu1 %919 }
 0x16b   : > { %v904_v18 = vpop.permute.xlu0 %903  ;;  %v1206_v5 = vsel %vm1174_vm5, %v1173_v24, %v920_v12 }
 0x16c   : > { %v1190_v16 = vsel %vm1174_vm5, %v1157_v31, %v904_v18 }
 0x16e   : > { %v953_v29 = vpop.permute.xlu1 %952 }
 0x16f   : > { %v937_v40 = vpop.permute.xlu0 %936  ;;  %v1237_v56 = vsel %vm1207_vm7, %v1204_v43, %v953_v29 }
 0x170   : > { %v1221_v14 = vsel %vm1207_vm7, %v1188_v49, %v937_v40 }
 0x172   : > { %v955_v0 = vpop.permute.xlu1 %954 }
 0x173   : > { %v939_v60 = vpop.permute.xlu0 %938  ;;  %v1239_v28 = vsel %vm1207_vm7, %v1206_v5, %v955_v0 }
 0x174   : > { %v1223_v36 = vsel %vm1207_vm7, %v1190_v16, %v939_v60 }
 0x176   : > { %v990_v6 = vpop.permute.xlu1 %989 }
 0x177   : > { %v974_v23 = vpop.permute.xlu0 %973  ;;  %v1270_v58 = vsel %vm1240_vm8, %v1237_v56, %v990_v6 }
 0x178   : > { %v1254_v41 = vsel %vm1240_vm8, %v1221_v14, %v974_v23 }
 0x17a   : > { %v992_v53 = vpop.permute.xlu1 %991 }
 0x17b   : > { %v976_v34 = vpop.permute.xlu0 %975  ;;  %v1272_v54 = vsel %vm1240_vm8, %v1239_v28, %v992_v53 }
 0x17c   : > { %v1256_v55 = vsel %vm1240_vm8, %v1223_v36, %v976_v34 }
 0x17e   : > { %v1037_v52 = vpop.permute.xlu1 %1036 }
 0x17f   : > { %v1021_v7 = vpop.permute.xlu0 %1020  ;;  %v1303_v3 = vsel %vm1273_vm9, %v1270_v58, %v1037_v52 }
 0x180   : > { %v1287_v45 = vsel %vm1273_vm9, %v1254_v41, %v1021_v7 }
 0x182   : > { %v1039_v20 = vpop.permute.xlu1 %1038 }
 0x183   : > { %v1023_v44 = vpop.permute.xlu0 %1022  ;;  %v1305_v17 = vsel %vm1273_vm9, %v1272_v54, %v1039_v20 }
 0x184   : > { %v1289_v51 = vsel %vm1273_vm9, %v1256_v55, %v1023_v44 }
 0x186   : > { %v1072_v61 = vpop.permute.xlu1 %1071 }
 0x187   : > { %v1336_v63 = vsel %vm1306_vm10, %v1303_v3, %v1072_v61  ;;  %v1056_v9 = vpop.permute.xlu0 %1055 }
 0x188   : > { %2193 = vmatprep.mubr.msk.bf16.mxu1 %vm1366_vm11, %v1336_v63  ;;  %v1320_v4 = vsel %vm1306_vm10, %v1287_v45, %v1056_v9 }
 0x189   : > { %2177 = vmatprep.mubr.msk.bf16.mxu0 %vm1366_vm11, %v1320_v4 }
 0x18a   : > { %v1074_v13 = vpop.permute.xlu1 %1073 }
 0x18b   : > { %v1338_v30 = vsel %vm1306_vm10, %v1305_v17, %v1074_v13  ;;  %v1058_v21 = vpop.permute.xlu0 %1057 }
 0x18c   : > { %2194 = vmatmul.mubr.msk.bf16.gmra.mrb[12].mxu1 %vm1366_vm11, %v1338_v30  ;;  %v1322_v37 = vsel %vm1306_vm10, %v1289_v51, %v1058_v21 }
 0x18d   : > { %2178 = vmatmul.mubr.msk.bf16.gmra.mrb[12].mxu0 %vm1366_vm11, %v1322_v37 }
 0x1a3   : > { %v2183_v39 = vpop.f32.mrb[0].mxu1 }
 0x1a4   : > { %v1510_v48 = vadd.f32 %v2183_v39, %v3173_v10  ;;  %v1501_v57 = vpop.f32.mrb[1].mxu1  ;;  %v2167_v25 = vpop.f32.mrb[0].mxu0 }
 0x1a5   : > { %v1502_v1 = vadd.f32 %v3173_v10, %v1501_v57  ;;  %v2184_v32 = vpop.f32.mrb[2].mxu1  ;;  %v1446_v33 = vadd.f32 %v2167_v25, %v3173_v10  ;;  %v1437_v59 = vpop.f32.mrb[1].mxu0 }
 0x1a6   : > { %v1513_v62 = vadd.f32 %v2184_v32, %v3173_v10  ;;  %v1504_v27 = vpop.f32.mrb[3].mxu1  ;;  %v1438_v46 = vadd.f32 %v3173_v10, %v1437_v59  ;;  %v2168_v19 = vpop.f32.mrb[2].mxu0  ;;  %v1582_v12 = vmax.f32 %v1510_v48, 0.0 }
 0x1a7   : > { %v1505_v35 = vadd.f32 %v3173_v10, %v1504_v27  ;;  %v1449_v18 = vadd.f32 %v2168_v19, %v3173_v10  ;;  %v1440_v40 = vpop.f32.mrb[3].mxu0  ;;  %v1580_v0 = vmax.f32 %v1502_v1, 0.0  ;;  %v1566_v23 = vmax.f32 %v1446_v33, 0.0 }
 0x1a8   : > { %v1583_v29 = vmax.f32 %v1513_v62, 0.0  ;;  %v1441_v60 = vadd.f32 %v3173_v10, %v1440_v40  ;;  %v1564_v52 = vmax.f32 %v1438_v46, 0.0 }
 0x1a9   : > { %v1581_v6 = vmax.f32 %v1505_v35, 0.0  ;;  %v1567_v53 = vmax.f32 %v1449_v18, 0.0 }
 0x1aa   : > { %v2093_v34 = vpack.c.bf16 %v1583_v29, %v1582_v12  ;;  %v1565_v50 = vmax.f32 %v1441_v60, 0.0 }
 0x1ab   : > { %v2088_v7 = vpack.c.bf16 %v1581_v6, %v1580_v0  ;;  %v2053_v47 = vpack.c.bf16 %v1567_v53, %v1566_v23 }
 0x1ac   : > { %2133 = vst [vmem:[%s3186_s9 + $0x48] sm:$0xff] %v2093_v34   ;;  %v2048_v38 = vpack.c.bf16 %v1565_v50, %v1564_v52 }
 0x1ad   : > { %2132 = vst [vmem:[%s3186_s9 + $0x40] sm:$0xff] %v2088_v7   ;;  %2125 = vst [vmem:[%s3186_s9 + $0x8] sm:$0xff] %v2053_v47  }
 0x1ae   : > { %2049 = vst [vmem:[%s3186_s9] sm:$0xff] %v2048_v38  }
 0x1e3   : > { %v2187_v8 = vpop.f32.mrb[4].mxu1 }
 0x1e4   : > { %v1526_v20 = vadd.f32 %v2187_v8, %v3173_v10  ;;  %v1517_v42 = vpop.f32.mrb[5].mxu1  ;;  %v2171_v43 = vpop.f32.mrb[4].mxu0 }
 0x1e5   : > { %v1518_v11 = vadd.f32 %v3173_v10, %v1517_v42  ;;  %v2188_v15 = vpop.f32.mrb[6].mxu1  ;;  %v1462_v56 = vadd.f32 %v2171_v43, %v3173_v10  ;;  %v1453_v44 = vpop.f32.mrb[5].mxu0 }
 0x1e6   : > { %v1529_v22 = vadd.f32 %v2188_v15, %v3173_v10  ;;  %v1520_v49 = vpop.f32.mrb[7].mxu1  ;;  %v1454_v58 = vadd.f32 %v3173_v10, %v1453_v44  ;;  %v2172_v2 = vpop.f32.mrb[6].mxu0  ;;  %v1586_v14 = vmax.f32 %v1526_v20, 0.0 }
 0x1e7   : > { %v1521_v24 = vadd.f32 %v3173_v10, %v1520_v49  ;;  %v1465_v3 = vadd.f32 %v2172_v2, %v3173_v10  ;;  %v1456_v26 = vpop.f32.mrb[7].mxu0  ;;  %v1584_v5 = vmax.f32 %v1518_v11, 0.0  ;;  %v1570_v31 = vmax.f32 %v1462_v56, 0.0 }
 0x1e8   : > { %v1587_v61 = vmax.f32 %v1529_v22, 0.0  ;;  %v1457_v41 = vadd.f32 %v3173_v10, %v1456_v26  ;;  %v1568_v9 = vmax.f32 %v1454_v58, 0.0 }
 0x1e9   : > { %v1585_v63 = vmax.f32 %v1521_v24, 0.0  ;;  %v1571_v28 = vmax.f32 %v1465_v3, 0.0 }
 0x1ea   : > { %v2103_v45 = vpack.c.bf16 %v1587_v61, %v1586_v14  ;;  %v1569_v16 = vmax.f32 %v1457_v41, 0.0 }
 0x1eb   : > { %v2098_v54 = vpack.c.bf16 %v1585_v63, %v1584_v5  ;;  %v2063_v4 = vpack.c.bf16 %v1571_v28, %v1570_v31 }
 0x1ec   : > { %2135 = vst [vmem:[%s3186_s9 + $0x58] sm:$0xff] %v2103_v45   ;;  %v2058_v36 = vpack.c.bf16 %v1569_v16, %v1568_v9 }
 0x1ed   : > { %2134 = vst [vmem:[%s3186_s9 + $0x50] sm:$0xff] %v2098_v54   ;;  %2127 = vst [vmem:[%s3186_s9 + $0x18] sm:$0xff] %v2063_v4  }
 0x1ee   : > { %2126 = vst [vmem:[%s3186_s9 + $0x10] sm:$0xff] %v2058_v36  }
 0x223   : > { %v2191_v17 = vpop.f32.mrb[8].mxu1 }
 0x224   : > { %v1542_v13 = vadd.f32 %v2191_v17, %v3173_v10  ;;  %v1533_v55 = vpop.f32.mrb[9].mxu1  ;;  %v2175_v30 = vpop.f32.mrb[8].mxu0 }
 0x225   : > { %v1534_v51 = vadd.f32 %v3173_v10, %v1533_v55  ;;  %v2192_v21 = vpop.f32.mrb[10].mxu1  ;;  %v1478_v37 = vadd.f32 %v2175_v30, %v3173_v10  ;;  %v1469_v39 = vpop.f32.mrb[9].mxu0 }
 0x226   : > { %v1545_v48 = vadd.f32 %v2192_v21, %v3173_v10  ;;  %v1536_v57 = vpop.f32.mrb[11].mxu1  ;;  %v1470_v25 = vadd.f32 %v3173_v10, %v1469_v39  ;;  %v2176_v1 = vpop.f32.mrb[10].mxu0  ;;  %v1590_v33 = vmax.f32 %v1542_v13, 0.0 }
 0x227   : > { %v1537_v32 = vadd.f32 %v3173_v10, %v1536_v57  ;;  %v1481_v59 = vadd.f32 %v2176_v1, %v3173_v10  ;;  %v1472_v27 = vpop.f32.mrb[11].mxu0  ;;  %v1588_v46 = vmax.f32 %v1534_v51, 0.0  ;;  %v1574_v12 = vmax.f32 %v1478_v37, 0.0 }
 0x228   : > { %v1591_v62 = vmax.f32 %v1545_v48, 0.0  ;;  %v1473_v19 = vadd.f32 %v3173_v10, %v1472_v27  ;;  %v1572_v40 = vmax.f32 %v1470_v25, 0.0 }
 0x229   : > { %v1589_v35 = vmax.f32 %v1537_v32, 0.0  ;;  %v1575_v18 = vmax.f32 %v1481_v59, 0.0 }
 0x22a   : > { %v2113_v29 = vpack.c.bf16 %v1591_v62, %v1590_v33  ;;  %v1573_v0 = vmax.f32 %v1473_v19, 0.0 }
 0x22b   : > { %v2108_v60 = vpack.c.bf16 %v1589_v35, %v1588_v46  ;;  %v2073_v6 = vpack.c.bf16 %v1575_v18, %v1574_v12 }
 0x22c   : > { %2137 = vst [vmem:[%s3186_s9 + $0x68] sm:$0xff] %v2113_v29   ;;  %v2068_v23 = vpack.c.bf16 %v1573_v0, %v1572_v40 }
 0x22d   : > { %2136 = vst [vmem:[%s3186_s9 + $0x60] sm:$0xff] %v2108_v60   ;;  %2129 = vst [vmem:[%s3186_s9 + $0x28] sm:$0xff] %v2073_v6  }
 0x22e   : > { %2128 = vst [vmem:[%s3186_s9 + $0x20] sm:$0xff] %v2068_v23  }
 0x25f   : > { %v2195_v53 = vpop.f32.mrb[12].mxu1 }
 0x260   : > { %v1558_v34 = vadd.f32 %v2195_v53, %v3173_v10  ;;  %v1549_v52 = vpop.f32.mrb[13].mxu1  ;;  %v2179_v50 = vpop.f32.mrb[12].mxu0 }
 0x261   : > { %v1550_v7 = vadd.f32 %v3173_v10, %v1549_v52  ;;  %v2196_v47 = vpop.f32.mrb[14].mxu1  ;;  %v1494_v38 = vadd.f32 %v2179_v50, %v3173_v10  ;;  %v1485_v8 = vpop.f32.mrb[13].mxu0 }
 0x262   : > { %v1561_v20 = vadd.f32 %v2196_v47, %v3173_v10  ;;  %v1552_v42 = vpop.f32.mrb[15].mxu1  ;;  %v1486_v43 = vadd.f32 %v3173_v10, %v1485_v8  ;;  %v2180_v11 = vpop.f32.mrb[14].mxu0  ;;  %v1594_v56 = vmax.f32 %v1558_v34, 0.0 }
 0x263   : > { %v1553_v15 = vadd.f32 %v3173_v10, %v1552_v42  ;;  %v1497_v44 = vadd.f32 %v2180_v11, %v3173_v10  ;;  %v1488_v49 = vpop.f32.mrb[15].mxu0  ;;  %v1592_v58 = vmax.f32 %v1550_v7, 0.0  ;;  %v1578_v14 = vmax.f32 %v1494_v38, 0.0 }
 0x264   : > { %v1595_v22 = vmax.f32 %v1561_v20, 0.0  ;;  %v1489_v2 = vadd.f32 %v3173_v10, %v1488_v49  ;;  %v1576_v26 = vmax.f32 %v1486_v43, 0.0 }
 0x265   : > { %v1593_v24 = vmax.f32 %v1553_v15, 0.0  ;;  %v1579_v3 = vmax.f32 %v1497_v44, 0.0 }
 0x266   : > { %v2123_v61 = vpack.c.bf16 %v1595_v22, %v1594_v56  ;;  %v1577_v5 = vmax.f32 %v1489_v2, 0.0 }
 0x267   : > { %v2118_v41 = vpack.c.bf16 %v1593_v24, %v1592_v58  ;;  %v2083_v63 = vpack.c.bf16 %v1579_v3, %v1578_v14 }
 0x268   : > { %2139 = vst [vmem:[%s3186_s9 + $0x78] sm:$0xff] %v2123_v61   ;;  %v2078_v10 = vpack.c.bf16 %v1577_v5, %v1576_v26 }
 0x269   : > { %2138 = vst [vmem:[%s3186_s9 + $0x70] sm:$0xff] %v2118_v41   ;;  %2131 = vst [vmem:[%s3186_s9 + $0x38] sm:$0xff] %v2083_v63  }
 0x26a   : > { %2130 = vst [vmem:[%s3186_s9 + $0x30] sm:$0xff] %v2078_v10  }
 0x26b   : > { %2326 = shalt.err (!%p2323_p5)
}
 0x26c   : > { %s2327_s5 = scalar_lea.hbm %s3230_s6, 2048  ;;  %s2331_s7 = scalar_lea.hbm %s3290_s4, 4096 }
 0x26d   : > { %p2328_p6 = scmp.ne.s32.totalorder %s3230_s6, %s2327_s5  ;;  %p2332_p10 = scmp.lt.u32.totalorder %s3230_s6, %s3290_s4 }
 0x26e   : > { %p2333_p11 = scmp.lt.u32.totalorder %s2331_s7, %s2327_s5  ;;  %p2335_p13 = scmp.lt.u32.totalorder %s2327_s5, %s3230_s6 }
 0x26f   : > { %p2329_p7 = pnand %p2328_p6, %p2468_p4 }
 0x270   : > { %p2334_p12 = por %p2333_p11, %p2332_p10 }
 0x271   : > { %p2330_p9 = pneg %p2329_p7 }
 0x272   : > { %p2336_p0 = por %p2335_p13, %p2334_p12 }
 0x274   : > { %p2337_p1 = pnand %p2336_p0, %p2330_p9 }
 0x276   : > { %2340 = shalt.err (!%p2337_p1)
}
 0x277   : > { %s2402_s11 = smov 64  }
 0x278   : > { %2207 = dma.vmem_to_hbm [thread:$0]  (%p2468_p4), %s3233_s12, 2048, %s3230_s6, %s3239_s18, %s2402_s11, %s2402_s11, %s2395_s10  }
 0x279 PF: > { %p2214_p2 = scmp.ge.s32.totalorder %s2391_s20, 2  ;;  %s1788_s13 = sand.u32 1, %s2371_s15  }
 0x27a   : > { %s1789_s26 = scalar_lea.sflag [#allocation3], %s1788_s13 }
 0x27b   : > { %p2210_p3 = pnand %p2214_p2, %p2475_p8 }
 0x27d   : > { %2366 = dma.done.wait (!%p2210_p3), %s1789_s26, 2048  }
 0x27e   : > { %2368 = vsyncadd (!%p2210_p3), %s1789_s26, 4294965248  ;;  %s17_s20 = sadd.s32 1, %s2391_s20   ;;  %s3293_s15 = smov %s2375_s16 }
 0x27f   : > { %p14_p5 = scmp.ge.s32.totalorder %s17_s20, 4   ;;  %s3294_s16 = smov %s2379_s17 }
 0x280   : > { %s3295_s17 = smov %s2481_s28  ;;  %s3296_s18 = smov %s2387_s19 }
 0x281   : > { %s3297_s19 = smov %s3299_s23  ;;  %16 = sbr.rel (!%p14_p5) target bundleno = 4 (0x4), region = 80 }
 0x288   :  { %1794 = vsyncpa [#allocation3], 1 }
 0x289   :  { %1796 = vsyncpa [#allocation3 + $0x1], 1 }

</bundles_post_ra>
